<compile_context>
chip_gen: v7x
topology: tpu7x:2x2x1
jax: 0.10.0
libtpu: 0.0.40
codegen_flags: <defaults>
</compile_context>

<pallas_src>
import functools

import jax
import jax.numpy as jnp
from jax.experimental import pallas as pl
from jax.experimental.pallas import tpu as pltpu

IN_F = 7
HID_F = 8
OUT_F = 3


def _seed_classifier_kernel(w1_ref, b1_ref, w2_ref, b2_ref, x_ref, o_ref, *,
                            chunk_rows, n_chunks):
    """One batch block.

    w1_ref: (8, 7)          f32 SMEM  (torch [out, in] layout)
    b1_ref: (8,)            f32 SMEM
    w2_ref: (3, 8)          f32 SMEM
    b2_ref: (3,)            f32 SMEM
    x_ref : (7, rows, 128)  f32 VMEM  (batch = rows x 128; fully dense slabs)
    o_ref : (3, rows, 128)  f32 VMEM
    """

    @pl.loop(0, n_chunks)
    def _(c):
        r0 = pl.multiple_of(c * chunk_rows, chunk_rows)

        # Output accumulators seeded with the fc2 bias: 3 dense (chunk, 128) slabs.
        acc = [jnp.full((chunk_rows, 128), b2_ref[m], dtype=jnp.float32)
               for m in range(OUT_F)]

        for j in range(HID_F):
            # fc1 row j + ReLU: unrolled VPU broadcast-FMAs on sublane+lane-dense slabs.
            h = w1_ref[j, 0] * x_ref[0, pl.ds(r0, chunk_rows), :]
            for k in range(1, IN_F):
                h = h + w1_ref[j, k] * x_ref[k, pl.ds(r0, chunk_rows), :]
            h = jnp.maximum(h + b1_ref[j], 0.0)
            # fc2: fold hidden unit j into the three output accumulators.
            for m in range(OUT_F):
                acc[m] = acc[m] + w2_ref[m, j] * h

        for m in range(OUT_F):
            o_ref[m, pl.ds(r0, chunk_rows), :] = acc[m].astype(o_ref.dtype)


def _block_geometry(total_rows, max_rows_per_block):
    """rows-per-block (multiple of 64/8) and grid size; prefer an even #steps when >1."""
    if total_rows <= max_rows_per_block:
        return total_rows, 1                       # clamp: never pad up to the block size
    n_blocks = pl.cdiv(total_rows, max_rows_per_block)
    if n_blocks % 2:                               # even step count -> both v7x TCs busy
        n_blocks += 1
    rows_blk = pl.cdiv(total_rows, n_blocks)
    rows_blk = ((rows_blk + 63) // 64) * 64        # multiple of 64 -> clean 64-row chunks
    return rows_blk, pl.cdiv(total_rows, rows_blk)


def seed_classifier_forward_fmaj(x_fmaj, w1, b1, w2, b2, *, max_rows_per_block=1024):
    """Preferred entry point: x_fmaj is feature-major (7, B); returns logits (3, B).

    Keeping this layout in the surrounding graph avoids the two extra HBM passes a
    (B, 7) <-> (7, B) transpose pair would cost around a memory-bound kernel.
    """
    assert x_fmaj.shape[0] == IN_F
    B = x_fmaj.shape[1]

    # Pad only to a whole number of (8 sublane x 128 lane) vregs, never to block size.
    b_pad = ((B + 1023) // 1024) * 1024
    if b_pad != B:
        x_fmaj = jnp.pad(x_fmaj, ((0, 0), (0, b_pad - B)))

    total_rows = b_pad // 128
    rows_blk, n_blocks = _block_geometry(total_rows, max_rows_per_block)
    chunk_rows = max(d for d in (64, 32, 16, 8) if rows_blk % d == 0)
    n_chunks = rows_blk // chunk_rows

    x3 = x_fmaj.reshape(IN_F, total_rows, 128)     # contiguous -> free reshape

    kernel = functools.partial(_seed_classifier_kernel,
                               chunk_rows=chunk_rows, n_chunks=n_chunks)
    smem_spec = pl.BlockSpec(memory_space=pltpu.MemorySpace.SMEM)

    out3 = pl.pallas_call(
        kernel,
        out_shape=jax.ShapeDtypeStruct((OUT_F, total_rows, 128), jnp.float32),
        grid=(n_blocks,),
        in_specs=[
            smem_spec,  # w1 (SMEM-resident across the grid)
            smem_spec,  # b1
            smem_spec,  # w2
            smem_spec,  # b2
            pl.BlockSpec((IN_F, rows_blk, 128), lambda i: (0, i, 0)),  # dense batch tile
        ],
        out_specs=pl.BlockSpec((OUT_F, rows_blk, 128), lambda i: (0, i, 0)),
        compiler_params=pltpu.CompilerParams(
            dimension_semantics=("parallel",),      # megacore-shard the batch axis
            vmem_limit_bytes=48 * 1024 * 1024,      # explicit; fits v7x's 64 MiB VMEM
        ),
    )(w1, b1, w2, b2, x3)

    return out3.reshape(OUT_F, b_pad)[:, :B]


def seed_classifier_forward(x, w1, b1, w2, b2, **kwargs):
    """Torch-style API: x (B, 7) -> logits (B, 3). Adds one transpose on each side;
    callers that can adopt the feature-major layout should use the *_fmaj entry point."""
    return seed_classifier_forward_fmaj(x.T, w1, b1, w2, b2, **kwargs).T


def init_params(key):
    """Deterministic init mirroring nn.Linear (torch (out, in) weight layout)."""
    k1, k2, k3, k4 = jax.random.split(key, 4)
    bound1 = 1.0 / jnp.sqrt(float(IN_F))
    w1 = jax.random.uniform(k1, (HID_F, IN_F), jnp.float32, -bound1, bound1)
    b1 = jax.random.uniform(k2, (HID_F,), jnp.float32, -bound1, bound1)
    bound2 = 1.0 / jnp.sqrt(float(HID_F))
    w2 = jax.random.uniform(k3, (OUT_F, HID_F), jnp.float32, -bound2, bound2)
    b2 = jax.random.uniform(k4, (OUT_F,), jnp.float32, -bound2, bound2)
    return w1, b1, w2, b2


def reference_forward(x, w1, b1, w2, b2):
    h = jnp.maximum(
        jnp.dot(x, w1.T, precision=jax.lax.Precision.HIGHEST) + b1, 0.0)
    return jnp.dot(h, w2.T, precision=jax.lax.Precision.HIGHEST) + b2


if __name__ == "__main__":
    key = jax.random.PRNGKey(0)
    k_x, k_p = jax.random.split(key)

    # Small but non-trivial: exercises batch padding (2500 -> 3072) and in-kernel chunking.
    B = 2500
    x = jax.random.normal(k_x, (B, IN_F), dtype=jnp.float32)
    w1, b1, w2, b2 = init_params(k_p)

    ref = reference_forward(x, w1, b1, w2, b2)

    # Torch-style (B, 7) -> (B, 3) wrapper.
    out = seed_classifier_forward(x, w1, b1, w2, b2)
    out = jax.block_until_ready(out)
    assert out.shape == (B, OUT_F), out.shape
    assert jnp.allclose(out, ref, atol=1e-5, rtol=1e-5), "mismatch vs reference"

    # Preferred transpose-free feature-major entry point.
    out_f = seed_classifier_forward_fmaj(x.T, w1, b1, w2, b2)
    out_f = jax.block_until_ready(out_f)
    assert out_f.shape == (OUT_F, B), out_f.shape
    assert jnp.allclose(out_f.T, ref, atol=1e-5, rtol=1e-5), "fmaj mismatch vs reference"

    print("KERNEL_OK")
</pallas_src>

<mosaic_0001>
module attributes {stable_mosaic.version = 11 : i64} {
  func.func @_seed_classifier_kernel(%arg0: i32, %arg1: memref<8x7xf32, #tpu.memory_space<smem>>, %arg2: memref<8xf32, #tpu.memory_space<smem>>, %arg3: memref<3x8xf32, #tpu.memory_space<smem>>, %arg4: memref<3xf32, #tpu.memory_space<smem>>, %arg5: memref<7x24x128xf32, #tpu.memory_space<vmem>>, %arg6: memref<3x24x128xf32, #tpu.memory_space<vmem>>) attributes {dimension_semantics = [#tpu.dimension_semantics<parallel>], iteration_bounds = array<i64: 1>, scalar_prefetch = 0 : i64, scratch_operands = 0 : i64, tpu.core_type = #tpu.core_type<tc>, window_params = [{transform_indices = @transform_0, window_bounds = array<i64: 8, 7>}, {transform_indices = @transform_1, window_bounds = array<i64: 8>}, {transform_indices = @transform_2, window_bounds = array<i64: 3, 8>}, {transform_indices = @transform_3, window_bounds = array<i64: 3>}, {transform_indices = @transform_4, window_bounds = array<i64: 7, 24, 128>}, {transform_indices = @transform_5, window_bounds = array<i64: 3, 24, 128>}]} {
    %c0_i32 = arith.constant 0 : i32
    %c3_i32 = arith.constant 3 : i32
    %0 = arith.addi %c0_i32, %c3_i32 : i32
    %c1_i32 = arith.constant 1 : i32
    scf.for %arg7 = %c0_i32 to %0 step %c1_i32  : i32 {
      %c1_i32_1 = arith.constant 1 : i32
      %1 = arith.muli %arg7, %c1_i32_1 : i32
      %c0_i32_2 = arith.constant 0 : i32
      %2 = arith.addi %c0_i32_2, %1 : i32
      %c8_i32 = arith.constant 8 : i32
      %3 = arith.muli %2, %c8_i32 : i32
      %4 = tpu.assume_multiple %3, 8 : i32
      %c0 = arith.constant 0 : index
      %5 = memref.load %arg4[%c0] : memref<3xf32, #tpu.memory_space<smem>>
      %6 = vector.broadcast %5 : f32 to vector<8x128xf32>
      %c1 = arith.constant 1 : index
      %7 = memref.load %arg4[%c1] : memref<3xf32, #tpu.memory_space<smem>>
      %8 = vector.broadcast %7 : f32 to vector<8x128xf32>
      %c2 = arith.constant 2 : index
      %9 = memref.load %arg4[%c2] : memref<3xf32, #tpu.memory_space<smem>>
      %10 = vector.broadcast %9 : f32 to vector<8x128xf32>
      %c0_3 = arith.constant 0 : index
      %c0_4 = arith.constant 0 : index
      %11 = memref.load %arg1[%c0_3, %c0_4] : memref<8x7xf32, #tpu.memory_space<smem>>
      %c0_5 = arith.constant 0 : index
      %12 = arith.index_cast %4 : i32 to index
      %c0_6 = arith.constant 0 : index
      %13 = vector.load %arg5[%c0_5, %12, %c0_6] : memref<7x24x128xf32, #tpu.memory_space<vmem>>, vector<1x8x128xf32>
      %14 = vector.shape_cast %13 : vector<1x8x128xf32> to vector<8x128xf32>
      %15 = vector.broadcast %11 : f32 to vector<8x128xf32>
      %16 = arith.mulf %15, %14 : vector<8x128xf32>
      %c0_7 = arith.constant 0 : index
      %c1_8 = arith.constant 1 : index
      %17 = memref.load %arg1[%c0_7, %c1_8] : memref<8x7xf32, #tpu.memory_space<smem>>
      %c1_9 = arith.constant 1 : index
      %18 = arith.index_cast %4 : i32 to index
      %c0_10 = arith.constant 0 : index
      %19 = vector.load %arg5[%c1_9, %18, %c0_10] : memref<7x24x128xf32, #tpu.memory_space<vmem>>, vector<1x8x128xf32>
      %20 = vector.shape_cast %19 : vector<1x8x128xf32> to vector<8x128xf32>
      %21 = vector.broadcast %17 : f32 to vector<8x128xf32>
      %22 = arith.mulf %21, %20 : vector<8x128xf32>
      %23 = arith.addf %16, %22 : vector<8x128xf32>
      %c0_11 = arith.constant 0 : index
      %c2_12 = arith.constant 2 : index
      %24 = memref.load %arg1[%c0_11, %c2_12] : memref<8x7xf32, #tpu.memory_space<smem>>
      %c2_13 = arith.constant 2 : index
      %25 = arith.index_cast %4 : i32 to index
      %c0_14 = arith.constant 0 : index
      %26 = vector.load %arg5[%c2_13, %25, %c0_14] : memref<7x24x128xf32, #tpu.memory_space<vmem>>, vector<1x8x128xf32>
      %27 = vector.shape_cast %26 : vector<1x8x128xf32> to vector<8x128xf32>
      %28 = vector.broadcast %24 : f32 to vector<8x128xf32>
      %29 = arith.mulf %28, %27 : vector<8x128xf32>
      %30 = arith.addf %23, %29 : vector<8x128xf32>
      %c0_15 = arith.constant 0 : index
      %c3 = arith.constant 3 : index
      %31 = memref.load %arg1[%c0_15, %c3] : memref<8x7xf32, #tpu.memory_space<smem>>
      %c3_16 = arith.constant 3 : index
      %32 = arith.index_cast %4 : i32 to index
      %c0_17 = arith.constant 0 : index
      %33 = vector.load %arg5[%c3_16, %32, %c0_17] : memref<7x24x128xf32, #tpu.memory_space<vmem>>, vector<1x8x128xf32>
      %34 = vector.shape_cast %33 : vector<1x8x128xf32> to vector<8x128xf32>
      %35 = vector.broadcast %31 : f32 to vector<8x128xf32>
      %36 = arith.mulf %35, %34 : vector<8x128xf32>
      %37 = arith.addf %30, %36 : vector<8x128xf32>
      %c0_18 = arith.constant 0 : index
      %c4 = arith.constant 4 : index
      %38 = memref.load %arg1[%c0_18, %c4] : memref<8x7xf32, #tpu.memory_space<smem>>
      %c4_19 = arith.constant 4 : index
      %39 = arith.index_cast %4 : i32 to index
      %c0_20 = arith.constant 0 : index
      %40 = vector.load %arg5[%c4_19, %39, %c0_20] : memref<7x24x128xf32, #tpu.memory_space<vmem>>, vector<1x8x128xf32>
      %41 = vector.shape_cast %40 : vector<1x8x128xf32> to vector<8x128xf32>
      %42 = vector.broadcast %38 : f32 to vector<8x128xf32>
      %43 = arith.mulf %42, %41 : vector<8x128xf32>
      %44 = arith.addf %37, %43 : vector<8x128xf32>
      %c0_21 = arith.constant 0 : index
      %c5 = arith.constant 5 : index
      %45 = memref.load %arg1[%c0_21, %c5] : memref<8x7xf32, #tpu.memory_space<smem>>
      %c5_22 = arith.constant 5 : index
      %46 = arith.index_cast %4 : i32 to index
      %c0_23 = arith.constant 0 : index
      %47 = vector.load %arg5[%c5_22, %46, %c0_23] : memref<7x24x128xf32, #tpu.memory_space<vmem>>, vector<1x8x128xf32>
      %48 = vector.shape_cast %47 : vector<1x8x128xf32> to vector<8x128xf32>
      %49 = vector.broadcast %45 : f32 to vector<8x128xf32>
      %50 = arith.mulf %49, %48 : vector<8x128xf32>
      %51 = arith.addf %44, %50 : vector<8x128xf32>
      %c0_24 = arith.constant 0 : index
      %c6 = arith.constant 6 : index
      %52 = memref.load %arg1[%c0_24, %c6] : memref<8x7xf32, #tpu.memory_space<smem>>
      %c6_25 = arith.constant 6 : index
      %53 = arith.index_cast %4 : i32 to index
      %c0_26 = arith.constant 0 : index
      %54 = vector.load %arg5[%c6_25, %53, %c0_26] : memref<7x24x128xf32, #tpu.memory_space<vmem>>, vector<1x8x128xf32>
      %55 = vector.shape_cast %54 : vector<1x8x128xf32> to vector<8x128xf32>
      %56 = vector.broadcast %52 : f32 to vector<8x128xf32>
      %57 = arith.mulf %56, %55 : vector<8x128xf32>
      %58 = arith.addf %51, %57 : vector<8x128xf32>
      %c0_27 = arith.constant 0 : index
      %59 = memref.load %arg2[%c0_27] : memref<8xf32, #tpu.memory_space<smem>>
      %60 = vector.broadcast %59 : f32 to vector<8x128xf32>
      %61 = arith.addf %58, %60 : vector<8x128xf32>
      %cst = arith.constant 0.000000e+00 : f32
      %62 = vector.broadcast %cst : f32 to vector<8x128xf32>
      %63 = arith.maximumf %61, %62 : vector<8x128xf32>
      %c0_28 = arith.constant 0 : index
      %c0_29 = arith.constant 0 : index
      %64 = memref.load %arg3[%c0_28, %c0_29] : memref<3x8xf32, #tpu.memory_space<smem>>
      %65 = vector.broadcast %64 : f32 to vector<8x128xf32>
      %66 = arith.mulf %65, %63 : vector<8x128xf32>
      %67 = arith.addf %6, %66 : vector<8x128xf32>
      %c1_30 = arith.constant 1 : index
      %c0_31 = arith.constant 0 : index
      %68 = memref.load %arg3[%c1_30, %c0_31] : memref<3x8xf32, #tpu.memory_space<smem>>
      %69 = vector.broadcast %68 : f32 to vector<8x128xf32>
      %70 = arith.mulf %69, %63 : vector<8x128xf32>
      %71 = arith.addf %8, %70 : vector<8x128xf32>
      %c2_32 = arith.constant 2 : index
      %c0_33 = arith.constant 0 : index
      %72 = memref.load %arg3[%c2_32, %c0_33] : memref<3x8xf32, #tpu.memory_space<smem>>
      %73 = vector.broadcast %72 : f32 to vector<8x128xf32>
      %74 = arith.mulf %73, %63 : vector<8x128xf32>
      %75 = arith.addf %10, %74 : vector<8x128xf32>
      %c1_34 = arith.constant 1 : index
      %c0_35 = arith.constant 0 : index
      %76 = memref.load %arg1[%c1_34, %c0_35] : memref<8x7xf32, #tpu.memory_space<smem>>
      %c0_36 = arith.constant 0 : index
      %77 = arith.index_cast %4 : i32 to index
      %c0_37 = arith.constant 0 : index
      %78 = vector.load %arg5[%c0_36, %77, %c0_37] : memref<7x24x128xf32, #tpu.memory_space<vmem>>, vector<1x8x128xf32>
      %79 = vector.shape_cast %78 : vector<1x8x128xf32> to vector<8x128xf32>
      %80 = vector.broadcast %76 : f32 to vector<8x128xf32>
      %81 = arith.mulf %80, %79 : vector<8x128xf32>
      %c1_38 = arith.constant 1 : index
      %c1_39 = arith.constant 1 : index
      %82 = memref.load %arg1[%c1_38, %c1_39] : memref<8x7xf32, #tpu.memory_space<smem>>
      %c1_40 = arith.constant 1 : index
      %83 = arith.index_cast %4 : i32 to index
      %c0_41 = arith.constant 0 : index
      %84 = vector.load %arg5[%c1_40, %83, %c0_41] : memref<7x24x128xf32, #tpu.memory_space<vmem>>, vector<1x8x128xf32>
      %85 = vector.shape_cast %84 : vector<1x8x128xf32> to vector<8x128xf32>
      %86 = vector.broadcast %82 : f32 to vector<8x128xf32>
      %87 = arith.mulf %86, %85 : vector<8x128xf32>
      %88 = arith.addf %81, %87 : vector<8x128xf32>
      %c1_42 = arith.constant 1 : index
      %c2_43 = arith.constant 2 : index
      %89 = memref.load %arg1[%c1_42, %c2_43] : memref<8x7xf32, #tpu.memory_space<smem>>
      %c2_44 = arith.constant 2 : index
      %90 = arith.index_cast %4 : i32 to index
      %c0_45 = arith.constant 0 : index
      %91 = vector.load %arg5[%c2_44, %90, %c0_45] : memref<7x24x128xf32, #tpu.memory_space<vmem>>, vector<1x8x128xf32>
      %92 = vector.shape_cast %91 : vector<1x8x128xf32> to vector<8x128xf32>
      %93 = vector.broadcast %89 : f32 to vector<8x128xf32>
      %94 = arith.mulf %93, %92 : vector<8x128xf32>
      %95 = arith.addf %88, %94 : vector<8x128xf32>
      %c1_46 = arith.constant 1 : index
      %c3_47 = arith.constant 3 : index
      %96 = memref.load %arg1[%c1_46, %c3_47] : memref<8x7xf32, #tpu.memory_space<smem>>
      %c3_48 = arith.constant 3 : index
      %97 = arith.index_cast %4 : i32 to index
      %c0_49 = arith.constant 0 : index
      %98 = vector.load %arg5[%c3_48, %97, %c0_49] : memref<7x24x128xf32, #tpu.memory_space<vmem>>, vector<1x8x128xf32>
      %99 = vector.shape_cast %98 : vector<1x8x128xf32> to vector<8x128xf32>
      %100 = vector.broadcast %96 : f32 to vector<8x128xf32>
      %101 = arith.mulf %100, %99 : vector<8x128xf32>
      %102 = arith.addf %95, %101 : vector<8x128xf32>
      %c1_50 = arith.constant 1 : index
      %c4_51 = arith.constant 4 : index
      %103 = memref.load %arg1[%c1_50, %c4_51] : memref<8x7xf32, #tpu.memory_space<smem>>
      %c4_52 = arith.constant 4 : index
      %104 = arith.index_cast %4 : i32 to index
      %c0_53 = arith.constant 0 : index
      %105 = vector.load %arg5[%c4_52, %104, %c0_53] : memref<7x24x128xf32, #tpu.memory_space<vmem>>, vector<1x8x128xf32>
      %106 = vector.shape_cast %105 : vector<1x8x128xf32> to vector<8x128xf32>
      %107 = vector.broadcast %103 : f32 to vector<8x128xf32>
      %108 = arith.mulf %107, %106 : vector<8x128xf32>
      %109 = arith.addf %102, %108 : vector<8x128xf32>
      %c1_54 = arith.constant 1 : index
      %c5_55 = arith.constant 5 : index
      %110 = memref.load %arg1[%c1_54, %c5_55] : memref<8x7xf32, #tpu.memory_space<smem>>
      %c5_56 = arith.constant 5 : index
      %111 = arith.index_cast %4 : i32 to index
      %c0_57 = arith.constant 0 : index
      %112 = vector.load %arg5[%c5_56, %111, %c0_57] : memref<7x24x128xf32, #tpu.memory_space<vmem>>, vector<1x8x128xf32>
      %113 = vector.shape_cast %112 : vector<1x8x128xf32> to vector<8x128xf32>
      %114 = vector.broadcast %110 : f32 to vector<8x128xf32>
      %115 = arith.mulf %114, %113 : vector<8x128xf32>
      %116 = arith.addf %109, %115 : vector<8x128xf32>
      %c1_58 = arith.constant 1 : index
      %c6_59 = arith.constant 6 : index
      %117 = memref.load %arg1[%c1_58, %c6_59] : memref<8x7xf32, #tpu.memory_space<smem>>
      %c6_60 = arith.constant 6 : index
      %118 = arith.index_cast %4 : i32 to index
      %c0_61 = arith.constant 0 : index
      %119 = vector.load %arg5[%c6_60, %118, %c0_61] : memref<7x24x128xf32, #tpu.memory_space<vmem>>, vector<1x8x128xf32>
      %120 = vector.shape_cast %119 : vector<1x8x128xf32> to vector<8x128xf32>
      %121 = vector.broadcast %117 : f32 to vector<8x128xf32>
      %122 = arith.mulf %121, %120 : vector<8x128xf32>
      %123 = arith.addf %116, %122 : vector<8x128xf32>
      %c1_62 = arith.constant 1 : index
      %124 = memref.load %arg2[%c1_62] : memref<8xf32, #tpu.memory_space<smem>>
      %125 = vector.broadcast %124 : f32 to vector<8x128xf32>
      %126 = arith.addf %123, %125 : vector<8x128xf32>
      %cst_63 = arith.constant 0.000000e+00 : f32
      %127 = vector.broadcast %cst_63 : f32 to vector<8x128xf32>
      %128 = arith.maximumf %126, %127 : vector<8x128xf32>
      %c0_64 = arith.constant 0 : index
      %c1_65 = arith.constant 1 : index
      %129 = memref.load %arg3[%c0_64, %c1_65] : memref<3x8xf32, #tpu.memory_space<smem>>
      %130 = vector.broadcast %129 : f32 to vector<8x128xf32>
      %131 = arith.mulf %130, %128 : vector<8x128xf32>
      %132 = arith.addf %67, %131 : vector<8x128xf32>
      %c1_66 = arith.constant 1 : index
      %c1_67 = arith.constant 1 : index
      %133 = memref.load %arg3[%c1_66, %c1_67] : memref<3x8xf32, #tpu.memory_space<smem>>
      %134 = vector.broadcast %133 : f32 to vector<8x128xf32>
      %135 = arith.mulf %134, %128 : vector<8x128xf32>
      %136 = arith.addf %71, %135 : vector<8x128xf32>
      %c2_68 = arith.constant 2 : index
      %c1_69 = arith.constant 1 : index
      %137 = memref.load %arg3[%c2_68, %c1_69] : memref<3x8xf32, #tpu.memory_space<smem>>
      %138 = vector.broadcast %137 : f32 to vector<8x128xf32>
      %139 = arith.mulf %138, %128 : vector<8x128xf32>
      %140 = arith.addf %75, %139 : vector<8x128xf32>
      %c2_70 = arith.constant 2 : index
      %c0_71 = arith.constant 0 : index
      %141 = memref.load %arg1[%c2_70, %c0_71] : memref<8x7xf32, #tpu.memory_space<smem>>
      %c0_72 = arith.constant 0 : index
      %142 = arith.index_cast %4 : i32 to index
      %c0_73 = arith.constant 0 : index
      %143 = vector.load %arg5[%c0_72, %142, %c0_73] : memref<7x24x128xf32, #tpu.memory_space<vmem>>, vector<1x8x128xf32>
      %144 = vector.shape_cast %143 : vector<1x8x128xf32> to vector<8x128xf32>
      %145 = vector.broadcast %141 : f32 to vector<8x128xf32>
      %146 = arith.mulf %145, %144 : vector<8x128xf32>
      %c2_74 = arith.constant 2 : index
      %c1_75 = arith.constant 1 : index
      %147 = memref.load %arg1[%c2_74, %c1_75] : memref<8x7xf32, #tpu.memory_space<smem>>
      %c1_76 = arith.constant 1 : index
      %148 = arith.index_cast %4 : i32 to index
      %c0_77 = arith.constant 0 : index
      %149 = vector.load %arg5[%c1_76, %148, %c0_77] : memref<7x24x128xf32, #tpu.memory_space<vmem>>, vector<1x8x128xf32>
      %150 = vector.shape_cast %149 : vector<1x8x128xf32> to vector<8x128xf32>
      %151 = vector.broadcast %147 : f32 to vector<8x128xf32>
      %152 = arith.mulf %151, %150 : vector<8x128xf32>
      %153 = arith.addf %146, %152 : vector<8x128xf32>
      %c2_78 = arith.constant 2 : index
      %c2_79 = arith.constant 2 : index
      %154 = memref.load %arg1[%c2_78, %c2_79] : memref<8x7xf32, #tpu.memory_space<smem>>
      %c2_80 = arith.constant 2 : index
      %155 = arith.index_cast %4 : i32 to index
      %c0_81 = arith.constant 0 : index
      %156 = vector.load %arg5[%c2_80, %155, %c0_81] : memref<7x24x128xf32, #tpu.memory_space<vmem>>, vector<1x8x128xf32>
      %157 = vector.shape_cast %156 : vector<1x8x128xf32> to vector<8x128xf32>
      %158 = vector.broadcast %154 : f32 to vector<8x128xf32>
      %159 = arith.mulf %158, %157 : vector<8x128xf32>
      %160 = arith.addf %153, %159 : vector<8x128xf32>
      %c2_82 = arith.constant 2 : index
      %c3_83 = arith.constant 3 : index
      %161 = memref.load %arg1[%c2_82, %c3_83] : memref<8x7xf32, #tpu.memory_space<smem>>
      %c3_84 = arith.constant 3 : index
      %162 = arith.index_cast %4 : i32 to index
      %c0_85 = arith.constant 0 : index
      %163 = vector.load %arg5[%c3_84, %162, %c0_85] : memref<7x24x128xf32, #tpu.memory_space<vmem>>, vector<1x8x128xf32>
      %164 = vector.shape_cast %163 : vector<1x8x128xf32> to vector<8x128xf32>
      %165 = vector.broadcast %161 : f32 to vector<8x128xf32>
      %166 = arith.mulf %165, %164 : vector<8x128xf32>
      %167 = arith.addf %160, %166 : vector<8x128xf32>
      %c2_86 = arith.constant 2 : index
      %c4_87 = arith.constant 4 : index
      %168 = memref.load %arg1[%c2_86, %c4_87] : memref<8x7xf32, #tpu.memory_space<smem>>
      %c4_88 = arith.constant 4 : index
      %169 = arith.index_cast %4 : i32 to index
      %c0_89 = arith.constant 0 : index
      %170 = vector.load %arg5[%c4_88, %169, %c0_89] : memref<7x24x128xf32, #tpu.memory_space<vmem>>, vector<1x8x128xf32>
      %171 = vector.shape_cast %170 : vector<1x8x128xf32> to vector<8x128xf32>
      %172 = vector.broadcast %168 : f32 to vector<8x128xf32>
      %173 = arith.mulf %172, %171 : vector<8x128xf32>
      %174 = arith.addf %167, %173 : vector<8x128xf32>
      %c2_90 = arith.constant 2 : index
      %c5_91 = arith.constant 5 : index
      %175 = memref.load %arg1[%c2_90, %c5_91] : memref<8x7xf32, #tpu.memory_space<smem>>
      %c5_92 = arith.constant 5 : index
      %176 = arith.index_cast %4 : i32 to index
      %c0_93 = arith.constant 0 : index
      %177 = vector.load %arg5[%c5_92, %176, %c0_93] : memref<7x24x128xf32, #tpu.memory_space<vmem>>, vector<1x8x128xf32>
      %178 = vector.shape_cast %177 : vector<1x8x128xf32> to vector<8x128xf32>
      %179 = vector.broadcast %175 : f32 to vector<8x128xf32>
      %180 = arith.mulf %179, %178 : vector<8x128xf32>
      %181 = arith.addf %174, %180 : vector<8x128xf32>
      %c2_94 = arith.constant 2 : index
      %c6_95 = arith.constant 6 : index
      %182 = memref.load %arg1[%c2_94, %c6_95] : memref<8x7xf32, #tpu.memory_space<smem>>
      %c6_96 = arith.constant 6 : index
      %183 = arith.index_cast %4 : i32 to index
      %c0_97 = arith.constant 0 : index
      %184 = vector.load %arg5[%c6_96, %183, %c0_97] : memref<7x24x128xf32, #tpu.memory_space<vmem>>, vector<1x8x128xf32>
      %185 = vector.shape_cast %184 : vector<1x8x128xf32> to vector<8x128xf32>
      %186 = vector.broadcast %182 : f32 to vector<8x128xf32>
      %187 = arith.mulf %186, %185 : vector<8x128xf32>
      %188 = arith.addf %181, %187 : vector<8x128xf32>
      %c2_98 = arith.constant 2 : index
      %189 = memref.load %arg2[%c2_98] : memref<8xf32, #tpu.memory_space<smem>>
      %190 = vector.broadcast %189 : f32 to vector<8x128xf32>
      %191 = arith.addf %188, %190 : vector<8x128xf32>
      %cst_99 = arith.constant 0.000000e+00 : f32
      %192 = vector.broadcast %cst_99 : f32 to vector<8x128xf32>
      %193 = arith.maximumf %191, %192 : vector<8x128xf32>
      %c0_100 = arith.constant 0 : index
      %c2_101 = arith.constant 2 : index
      %194 = memref.load %arg3[%c0_100, %c2_101] : memref<3x8xf32, #tpu.memory_space<smem>>
      %195 = vector.broadcast %194 : f32 to vector<8x128xf32>
      %196 = arith.mulf %195, %193 : vector<8x128xf32>
      %197 = arith.addf %132, %196 : vector<8x128xf32>
      %c1_102 = arith.constant 1 : index
      %c2_103 = arith.constant 2 : index
      %198 = memref.load %arg3[%c1_102, %c2_103] : memref<3x8xf32, #tpu.memory_space<smem>>
      %199 = vector.broadcast %198 : f32 to vector<8x128xf32>
      %200 = arith.mulf %199, %193 : vector<8x128xf32>
      %201 = arith.addf %136, %200 : vector<8x128xf32>
      %c2_104 = arith.constant 2 : index
      %c2_105 = arith.constant 2 : index
      %202 = memref.load %arg3[%c2_104, %c2_105] : memref<3x8xf32, #tpu.memory_space<smem>>
      %203 = vector.broadcast %202 : f32 to vector<8x128xf32>
      %204 = arith.mulf %203, %193 : vector<8x128xf32>
      %205 = arith.addf %140, %204 : vector<8x128xf32>
      %c3_106 = arith.constant 3 : index
      %c0_107 = arith.constant 0 : index
      %206 = memref.load %arg1[%c3_106, %c0_107] : memref<8x7xf32, #tpu.memory_space<smem>>
      %c0_108 = arith.constant 0 : index
      %207 = arith.index_cast %4 : i32 to index
      %c0_109 = arith.constant 0 : index
      %208 = vector.load %arg5[%c0_108, %207, %c0_109] : memref<7x24x128xf32, #tpu.memory_space<vmem>>, vector<1x8x128xf32>
      %209 = vector.shape_cast %208 : vector<1x8x128xf32> to vector<8x128xf32>
      %210 = vector.broadcast %206 : f32 to vector<8x128xf32>
      %211 = arith.mulf %210, %209 : vector<8x128xf32>
      %c3_110 = arith.constant 3 : index
      %c1_111 = arith.constant 1 : index
      %212 = memref.load %arg1[%c3_110, %c1_111] : memref<8x7xf32, #tpu.memory_space<smem>>
      %c1_112 = arith.constant 1 : index
      %213 = arith.index_cast %4 : i32 to index
      %c0_113 = arith.constant 0 : index
      %214 = vector.load %arg5[%c1_112, %213, %c0_113] : memref<7x24x128xf32, #tpu.memory_space<vmem>>, vector<1x8x128xf32>
      %215 = vector.shape_cast %214 : vector<1x8x128xf32> to vector<8x128xf32>
      %216 = vector.broadcast %212 : f32 to vector<8x128xf32>
      %217 = arith.mulf %216, %215 : vector<8x128xf32>
      %218 = arith.addf %211, %217 : vector<8x128xf32>
      %c3_114 = arith.constant 3 : index
      %c2_115 = arith.constant 2 : index
      %219 = memref.load %arg1[%c3_114, %c2_115] : memref<8x7xf32, #tpu.memory_space<smem>>
      %c2_116 = arith.constant 2 : index
      %220 = arith.index_cast %4 : i32 to index
      %c0_117 = arith.constant 0 : index
      %221 = vector.load %arg5[%c2_116, %220, %c0_117] : memref<7x24x128xf32, #tpu.memory_space<vmem>>, vector<1x8x128xf32>
      %222 = vector.shape_cast %221 : vector<1x8x128xf32> to vector<8x128xf32>
      %223 = vector.broadcast %219 : f32 to vector<8x128xf32>
      %224 = arith.mulf %223, %222 : vector<8x128xf32>
      %225 = arith.addf %218, %224 : vector<8x128xf32>
      %c3_118 = arith.constant 3 : index
      %c3_119 = arith.constant 3 : index
      %226 = memref.load %arg1[%c3_118, %c3_119] : memref<8x7xf32, #tpu.memory_space<smem>>
      %c3_120 = arith.constant 3 : index
      %227 = arith.index_cast %4 : i32 to index
      %c0_121 = arith.constant 0 : index
      %228 = vector.load %arg5[%c3_120, %227, %c0_121] : memref<7x24x128xf32, #tpu.memory_space<vmem>>, vector<1x8x128xf32>
      %229 = vector.shape_cast %228 : vector<1x8x128xf32> to vector<8x128xf32>
      %230 = vector.broadcast %226 : f32 to vector<8x128xf32>
      %231 = arith.mulf %230, %229 : vector<8x128xf32>
      %232 = arith.addf %225, %231 : vector<8x128xf32>
      %c3_122 = arith.constant 3 : index
      %c4_123 = arith.constant 4 : index
      %233 = memref.load %arg1[%c3_122, %c4_123] : memref<8x7xf32, #tpu.memory_space<smem>>
      %c4_124 = arith.constant 4 : index
      %234 = arith.index_cast %4 : i32 to index
      %c0_125 = arith.constant 0 : index
      %235 = vector.load %arg5[%c4_124, %234, %c0_125] : memref<7x24x128xf32, #tpu.memory_space<vmem>>, vector<1x8x128xf32>
      %236 = vector.shape_cast %235 : vector<1x8x128xf32> to vector<8x128xf32>
      %237 = vector.broadcast %233 : f32 to vector<8x128xf32>
      %238 = arith.mulf %237, %236 : vector<8x128xf32>
      %239 = arith.addf %232, %238 : vector<8x128xf32>
      %c3_126 = arith.constant 3 : index
      %c5_127 = arith.constant 5 : index
      %240 = memref.load %arg1[%c3_126, %c5_127] : memref<8x7xf32, #tpu.memory_space<smem>>
      %c5_128 = arith.constant 5 : index
      %241 = arith.index_cast %4 : i32 to index
      %c0_129 = arith.constant 0 : index
      %242 = vector.load %arg5[%c5_128, %241, %c0_129] : memref<7x24x128xf32, #tpu.memory_space<vmem>>, vector<1x8x128xf32>
      %243 = vector.shape_cast %242 : vector<1x8x128xf32> to vector<8x128xf32>
      %244 = vector.broadcast %240 : f32 to vector<8x128xf32>
      %245 = arith.mulf %244, %243 : vector<8x128xf32>
      %246 = arith.addf %239, %245 : vector<8x128xf32>
      %c3_130 = arith.constant 3 : index
      %c6_131 = arith.constant 6 : index
      %247 = memref.load %arg1[%c3_130, %c6_131] : memref<8x7xf32, #tpu.memory_space<smem>>
      %c6_132 = arith.constant 6 : index
      %248 = arith.index_cast %4 : i32 to index
      %c0_133 = arith.constant 0 : index
      %249 = vector.load %arg5[%c6_132, %248, %c0_133] : memref<7x24x128xf32, #tpu.memory_space<vmem>>, vector<1x8x128xf32>
      %250 = vector.shape_cast %249 : vector<1x8x128xf32> to vector<8x128xf32>
      %251 = vector.broadcast %247 : f32 to vector<8x128xf32>
      %252 = arith.mulf %251, %250 : vector<8x128xf32>
      %253 = arith.addf %246, %252 : vector<8x128xf32>
      %c3_134 = arith.constant 3 : index
      %254 = memref.load %arg2[%c3_134] : memref<8xf32, #tpu.memory_space<smem>>
      %255 = vector.broadcast %254 : f32 to vector<8x128xf32>
      %256 = arith.addf %253, %255 : vector<8x128xf32>
      %cst_135 = arith.constant 0.000000e+00 : f32
      %257 = vector.broadcast %cst_135 : f32 to vector<8x128xf32>
      %258 = arith.maximumf %256, %257 : vector<8x128xf32>
      %c0_136 = arith.constant 0 : index
      %c3_137 = arith.constant 3 : index
      %259 = memref.load %arg3[%c0_136, %c3_137] : memref<3x8xf32, #tpu.memory_space<smem>>
      %260 = vector.broadcast %259 : f32 to vector<8x128xf32>
      %261 = arith.mulf %260, %258 : vector<8x128xf32>
      %262 = arith.addf %197, %261 : vector<8x128xf32>
      %c1_138 = arith.constant 1 : index
      %c3_139 = arith.constant 3 : index
      %263 = memref.load %arg3[%c1_138, %c3_139] : memref<3x8xf32, #tpu.memory_space<smem>>
      %264 = vector.broadcast %263 : f32 to vector<8x128xf32>
      %265 = arith.mulf %264, %258 : vector<8x128xf32>
      %266 = arith.addf %201, %265 : vector<8x128xf32>
      %c2_140 = arith.constant 2 : index
      %c3_141 = arith.constant 3 : index
      %267 = memref.load %arg3[%c2_140, %c3_141] : memref<3x8xf32, #tpu.memory_space<smem>>
      %268 = vector.broadcast %267 : f32 to vector<8x128xf32>
      %269 = arith.mulf %268, %258 : vector<8x128xf32>
      %270 = arith.addf %205, %269 : vector<8x128xf32>
      %c4_142 = arith.constant 4 : index
      %c0_143 = arith.constant 0 : index
      %271 = memref.load %arg1[%c4_142, %c0_143] : memref<8x7xf32, #tpu.memory_space<smem>>
      %c0_144 = arith.constant 0 : index
      %272 = arith.index_cast %4 : i32 to index
      %c0_145 = arith.constant 0 : index
      %273 = vector.load %arg5[%c0_144, %272, %c0_145] : memref<7x24x128xf32, #tpu.memory_space<vmem>>, vector<1x8x128xf32>
      %274 = vector.shape_cast %273 : vector<1x8x128xf32> to vector<8x128xf32>
      %275 = vector.broadcast %271 : f32 to vector<8x128xf32>
      %276 = arith.mulf %275, %274 : vector<8x128xf32>
      %c4_146 = arith.constant 4 : index
      %c1_147 = arith.constant 1 : index
      %277 = memref.load %arg1[%c4_146, %c1_147] : memref<8x7xf32, #tpu.memory_space<smem>>
      %c1_148 = arith.constant 1 : index
      %278 = arith.index_cast %4 : i32 to index
      %c0_149 = arith.constant 0 : index
      %279 = vector.load %arg5[%c1_148, %278, %c0_149] : memref<7x24x128xf32, #tpu.memory_space<vmem>>, vector<1x8x128xf32>
      %280 = vector.shape_cast %279 : vector<1x8x128xf32> to vector<8x128xf32>
      %281 = vector.broadcast %277 : f32 to vector<8x128xf32>
      %282 = arith.mulf %281, %280 : vector<8x128xf32>
      %283 = arith.addf %276, %282 : vector<8x128xf32>
      %c4_150 = arith.constant 4 : index
      %c2_151 = arith.constant 2 : index
      %284 = memref.load %arg1[%c4_150, %c2_151] : memref<8x7xf32, #tpu.memory_space<smem>>
      %c2_152 = arith.constant 2 : index
      %285 = arith.index_cast %4 : i32 to index
      %c0_153 = arith.constant 0 : index
      %286 = vector.load %arg5[%c2_152, %285, %c0_153] : memref<7x24x128xf32, #tpu.memory_space<vmem>>, vector<1x8x128xf32>
      %287 = vector.shape_cast %286 : vector<1x8x128xf32> to vector<8x128xf32>
      %288 = vector.broadcast %284 : f32 to vector<8x128xf32>
      %289 = arith.mulf %288, %287 : vector<8x128xf32>
      %290 = arith.addf %283, %289 : vector<8x128xf32>
      %c4_154 = arith.constant 4 : index
      %c3_155 = arith.constant 3 : index
      %291 = memref.load %arg1[%c4_154, %c3_155] : memref<8x7xf32, #tpu.memory_space<smem>>
      %c3_156 = arith.constant 3 : index
      %292 = arith.index_cast %4 : i32 to index
      %c0_157 = arith.constant 0 : index
      %293 = vector.load %arg5[%c3_156, %292, %c0_157] : memref<7x24x128xf32, #tpu.memory_space<vmem>>, vector<1x8x128xf32>
      %294 = vector.shape_cast %293 : vector<1x8x128xf32> to vector<8x128xf32>
      %295 = vector.broadcast %291 : f32 to vector<8x128xf32>
      %296 = arith.mulf %295, %294 : vector<8x128xf32>
      %297 = arith.addf %290, %296 : vector<8x128xf32>
      %c4_158 = arith.constant 4 : index
      %c4_159 = arith.constant 4 : index
      %298 = memref.load %arg1[%c4_158, %c4_159] : memref<8x7xf32, #tpu.memory_space<smem>>
      %c4_160 = arith.constant 4 : index
      %299 = arith.index_cast %4 : i32 to index
      %c0_161 = arith.constant 0 : index
      %300 = vector.load %arg5[%c4_160, %299, %c0_161] : memref<7x24x128xf32, #tpu.memory_space<vmem>>, vector<1x8x128xf32>
      %301 = vector.shape_cast %300 : vector<1x8x128xf32> to vector<8x128xf32>
      %302 = vector.broadcast %298 : f32 to vector<8x128xf32>
      %303 = arith.mulf %302, %301 : vector<8x128xf32>
      %304 = arith.addf %297, %303 : vector<8x128xf32>
      %c4_162 = arith.constant 4 : index
      %c5_163 = arith.constant 5 : index
      %305 = memref.load %arg1[%c4_162, %c5_163] : memref<8x7xf32, #tpu.memory_space<smem>>
      %c5_164 = arith.constant 5 : index
      %306 = arith.index_cast %4 : i32 to index
      %c0_165 = arith.constant 0 : index
      %307 = vector.load %arg5[%c5_164, %306, %c0_165] : memref<7x24x128xf32, #tpu.memory_space<vmem>>, vector<1x8x128xf32>
      %308 = vector.shape_cast %307 : vector<1x8x128xf32> to vector<8x128xf32>
      %309 = vector.broadcast %305 : f32 to vector<8x128xf32>
      %310 = arith.mulf %309, %308 : vector<8x128xf32>
      %311 = arith.addf %304, %310 : vector<8x128xf32>
      %c4_166 = arith.constant 4 : index
      %c6_167 = arith.constant 6 : index
      %312 = memref.load %arg1[%c4_166, %c6_167] : memref<8x7xf32, #tpu.memory_space<smem>>
      %c6_168 = arith.constant 6 : index
      %313 = arith.index_cast %4 : i32 to index
      %c0_169 = arith.constant 0 : index
      %314 = vector.load %arg5[%c6_168, %313, %c0_169] : memref<7x24x128xf32, #tpu.memory_space<vmem>>, vector<1x8x128xf32>
      %315 = vector.shape_cast %314 : vector<1x8x128xf32> to vector<8x128xf32>
      %316 = vector.broadcast %312 : f32 to vector<8x128xf32>
      %317 = arith.mulf %316, %315 : vector<8x128xf32>
      %318 = arith.addf %311, %317 : vector<8x128xf32>
      %c4_170 = arith.constant 4 : index
      %319 = memref.load %arg2[%c4_170] : memref<8xf32, #tpu.memory_space<smem>>
      %320 = vector.broadcast %319 : f32 to vector<8x128xf32>
      %321 = arith.addf %318, %320 : vector<8x128xf32>
      %cst_171 = arith.constant 0.000000e+00 : f32
      %322 = vector.broadcast %cst_171 : f32 to vector<8x128xf32>
      %323 = arith.maximumf %321, %322 : vector<8x128xf32>
      %c0_172 = arith.constant 0 : index
      %c4_173 = arith.constant 4 : index
      %324 = memref.load %arg3[%c0_172, %c4_173] : memref<3x8xf32, #tpu.memory_space<smem>>
      %325 = vector.broadcast %324 : f32 to vector<8x128xf32>
      %326 = arith.mulf %325, %323 : vector<8x128xf32>
      %327 = arith.addf %262, %326 : vector<8x128xf32>
      %c1_174 = arith.constant 1 : index
      %c4_175 = arith.constant 4 : index
      %328 = memref.load %arg3[%c1_174, %c4_175] : memref<3x8xf32, #tpu.memory_space<smem>>
      %329 = vector.broadcast %328 : f32 to vector<8x128xf32>
      %330 = arith.mulf %329, %323 : vector<8x128xf32>
      %331 = arith.addf %266, %330 : vector<8x128xf32>
      %c2_176 = arith.constant 2 : index
      %c4_177 = arith.constant 4 : index
      %332 = memref.load %arg3[%c2_176, %c4_177] : memref<3x8xf32, #tpu.memory_space<smem>>
      %333 = vector.broadcast %332 : f32 to vector<8x128xf32>
      %334 = arith.mulf %333, %323 : vector<8x128xf32>
      %335 = arith.addf %270, %334 : vector<8x128xf32>
      %c5_178 = arith.constant 5 : index
      %c0_179 = arith.constant 0 : index
      %336 = memref.load %arg1[%c5_178, %c0_179] : memref<8x7xf32, #tpu.memory_space<smem>>
      %c0_180 = arith.constant 0 : index
      %337 = arith.index_cast %4 : i32 to index
      %c0_181 = arith.constant 0 : index
      %338 = vector.load %arg5[%c0_180, %337, %c0_181] : memref<7x24x128xf32, #tpu.memory_space<vmem>>, vector<1x8x128xf32>
      %339 = vector.shape_cast %338 : vector<1x8x128xf32> to vector<8x128xf32>
      %340 = vector.broadcast %336 : f32 to vector<8x128xf32>
      %341 = arith.mulf %340, %339 : vector<8x128xf32>
      %c5_182 = arith.constant 5 : index
      %c1_183 = arith.constant 1 : index
      %342 = memref.load %arg1[%c5_182, %c1_183] : memref<8x7xf32, #tpu.memory_space<smem>>
      %c1_184 = arith.constant 1 : index
      %343 = arith.index_cast %4 : i32 to index
      %c0_185 = arith.constant 0 : index
      %344 = vector.load %arg5[%c1_184, %343, %c0_185] : memref<7x24x128xf32, #tpu.memory_space<vmem>>, vector<1x8x128xf32>
      %345 = vector.shape_cast %344 : vector<1x8x128xf32> to vector<8x128xf32>
      %346 = vector.broadcast %342 : f32 to vector<8x128xf32>
      %347 = arith.mulf %346, %345 : vector<8x128xf32>
      %348 = arith.addf %341, %347 : vector<8x128xf32>
      %c5_186 = arith.constant 5 : index
      %c2_187 = arith.constant 2 : index
      %349 = memref.load %arg1[%c5_186, %c2_187] : memref<8x7xf32, #tpu.memory_space<smem>>
      %c2_188 = arith.constant 2 : index
      %350 = arith.index_cast %4 : i32 to index
      %c0_189 = arith.constant 0 : index
      %351 = vector.load %arg5[%c2_188, %350, %c0_189] : memref<7x24x128xf32, #tpu.memory_space<vmem>>, vector<1x8x128xf32>
      %352 = vector.shape_cast %351 : vector<1x8x128xf32> to vector<8x128xf32>
      %353 = vector.broadcast %349 : f32 to vector<8x128xf32>
      %354 = arith.mulf %353, %352 : vector<8x128xf32>
      %355 = arith.addf %348, %354 : vector<8x128xf32>
      %c5_190 = arith.constant 5 : index
      %c3_191 = arith.constant 3 : index
      %356 = memref.load %arg1[%c5_190, %c3_191] : memref<8x7xf32, #tpu.memory_space<smem>>
      %c3_192 = arith.constant 3 : index
      %357 = arith.index_cast %4 : i32 to index
      %c0_193 = arith.constant 0 : index
      %358 = vector.load %arg5[%c3_192, %357, %c0_193] : memref<7x24x128xf32, #tpu.memory_space<vmem>>, vector<1x8x128xf32>
      %359 = vector.shape_cast %358 : vector<1x8x128xf32> to vector<8x128xf32>
      %360 = vector.broadcast %356 : f32 to vector<8x128xf32>
      %361 = arith.mulf %360, %359 : vector<8x128xf32>
      %362 = arith.addf %355, %361 : vector<8x128xf32>
      %c5_194 = arith.constant 5 : index
      %c4_195 = arith.constant 4 : index
      %363 = memref.load %arg1[%c5_194, %c4_195] : memref<8x7xf32, #tpu.memory_space<smem>>
      %c4_196 = arith.constant 4 : index
      %364 = arith.index_cast %4 : i32 to index
      %c0_197 = arith.constant 0 : index
      %365 = vector.load %arg5[%c4_196, %364, %c0_197] : memref<7x24x128xf32, #tpu.memory_space<vmem>>, vector<1x8x128xf32>
      %366 = vector.shape_cast %365 : vector<1x8x128xf32> to vector<8x128xf32>
      %367 = vector.broadcast %363 : f32 to vector<8x128xf32>
      %368 = arith.mulf %367, %366 : vector<8x128xf32>
      %369 = arith.addf %362, %368 : vector<8x128xf32>
      %c5_198 = arith.constant 5 : index
      %c5_199 = arith.constant 5 : index
      %370 = memref.load %arg1[%c5_198, %c5_199] : memref<8x7xf32, #tpu.memory_space<smem>>
      %c5_200 = arith.constant 5 : index
      %371 = arith.index_cast %4 : i32 to index
      %c0_201 = arith.constant 0 : index
      %372 = vector.load %arg5[%c5_200, %371, %c0_201] : memref<7x24x128xf32, #tpu.memory_space<vmem>>, vector<1x8x128xf32>
      %373 = vector.shape_cast %372 : vector<1x8x128xf32> to vector<8x128xf32>
      %374 = vector.broadcast %370 : f32 to vector<8x128xf32>
      %375 = arith.mulf %374, %373 : vector<8x128xf32>
      %376 = arith.addf %369, %375 : vector<8x128xf32>
      %c5_202 = arith.constant 5 : index
      %c6_203 = arith.constant 6 : index
      %377 = memref.load %arg1[%c5_202, %c6_203] : memref<8x7xf32, #tpu.memory_space<smem>>
      %c6_204 = arith.constant 6 : index
      %378 = arith.index_cast %4 : i32 to index
      %c0_205 = arith.constant 0 : index
      %379 = vector.load %arg5[%c6_204, %378, %c0_205] : memref<7x24x128xf32, #tpu.memory_space<vmem>>, vector<1x8x128xf32>
      %380 = vector.shape_cast %379 : vector<1x8x128xf32> to vector<8x128xf32>
      %381 = vector.broadcast %377 : f32 to vector<8x128xf32>
      %382 = arith.mulf %381, %380 : vector<8x128xf32>
      %383 = arith.addf %376, %382 : vector<8x128xf32>
      %c5_206 = arith.constant 5 : index
      %384 = memref.load %arg2[%c5_206] : memref<8xf32, #tpu.memory_space<smem>>
      %385 = vector.broadcast %384 : f32 to vector<8x128xf32>
      %386 = arith.addf %383, %385 : vector<8x128xf32>
      %cst_207 = arith.constant 0.000000e+00 : f32
      %387 = vector.broadcast %cst_207 : f32 to vector<8x128xf32>
      %388 = arith.maximumf %386, %387 : vector<8x128xf32>
      %c0_208 = arith.constant 0 : index
      %c5_209 = arith.constant 5 : index
      %389 = memref.load %arg3[%c0_208, %c5_209] : memref<3x8xf32, #tpu.memory_space<smem>>
      %390 = vector.broadcast %389 : f32 to vector<8x128xf32>
      %391 = arith.mulf %390, %388 : vector<8x128xf32>
      %392 = arith.addf %327, %391 : vector<8x128xf32>
      %c1_210 = arith.constant 1 : index
      %c5_211 = arith.constant 5 : index
      %393 = memref.load %arg3[%c1_210, %c5_211] : memref<3x8xf32, #tpu.memory_space<smem>>
      %394 = vector.broadcast %393 : f32 to vector<8x128xf32>
      %395 = arith.mulf %394, %388 : vector<8x128xf32>
      %396 = arith.addf %331, %395 : vector<8x128xf32>
      %c2_212 = arith.constant 2 : index
      %c5_213 = arith.constant 5 : index
      %397 = memref.load %arg3[%c2_212, %c5_213] : memref<3x8xf32, #tpu.memory_space<smem>>
      %398 = vector.broadcast %397 : f32 to vector<8x128xf32>
      %399 = arith.mulf %398, %388 : vector<8x128xf32>
      %400 = arith.addf %335, %399 : vector<8x128xf32>
      %c6_214 = arith.constant 6 : index
      %c0_215 = arith.constant 0 : index
      %401 = memref.load %arg1[%c6_214, %c0_215] : memref<8x7xf32, #tpu.memory_space<smem>>
      %c0_216 = arith.constant 0 : index
      %402 = arith.index_cast %4 : i32 to index
      %c0_217 = arith.constant 0 : index
      %403 = vector.load %arg5[%c0_216, %402, %c0_217] : memref<7x24x128xf32, #tpu.memory_space<vmem>>, vector<1x8x128xf32>
      %404 = vector.shape_cast %403 : vector<1x8x128xf32> to vector<8x128xf32>
      %405 = vector.broadcast %401 : f32 to vector<8x128xf32>
      %406 = arith.mulf %405, %404 : vector<8x128xf32>
      %c6_218 = arith.constant 6 : index
      %c1_219 = arith.constant 1 : index
      %407 = memref.load %arg1[%c6_218, %c1_219] : memref<8x7xf32, #tpu.memory_space<smem>>
      %c1_220 = arith.constant 1 : index
      %408 = arith.index_cast %4 : i32 to index
      %c0_221 = arith.constant 0 : index
      %409 = vector.load %arg5[%c1_220, %408, %c0_221] : memref<7x24x128xf32, #tpu.memory_space<vmem>>, vector<1x8x128xf32>
      %410 = vector.shape_cast %409 : vector<1x8x128xf32> to vector<8x128xf32>
      %411 = vector.broadcast %407 : f32 to vector<8x128xf32>
      %412 = arith.mulf %411, %410 : vector<8x128xf32>
      %413 = arith.addf %406, %412 : vector<8x128xf32>
      %c6_222 = arith.constant 6 : index
      %c2_223 = arith.constant 2 : index
      %414 = memref.load %arg1[%c6_222, %c2_223] : memref<8x7xf32, #tpu.memory_space<smem>>
      %c2_224 = arith.constant 2 : index
      %415 = arith.index_cast %4 : i32 to index
      %c0_225 = arith.constant 0 : index
      %416 = vector.load %arg5[%c2_224, %415, %c0_225] : memref<7x24x128xf32, #tpu.memory_space<vmem>>, vector<1x8x128xf32>
      %417 = vector.shape_cast %416 : vector<1x8x128xf32> to vector<8x128xf32>
      %418 = vector.broadcast %414 : f32 to vector<8x128xf32>
      %419 = arith.mulf %418, %417 : vector<8x128xf32>
      %420 = arith.addf %413, %419 : vector<8x128xf32>
      %c6_226 = arith.constant 6 : index
      %c3_227 = arith.constant 3 : index
      %421 = memref.load %arg1[%c6_226, %c3_227] : memref<8x7xf32, #tpu.memory_space<smem>>
      %c3_228 = arith.constant 3 : index
      %422 = arith.index_cast %4 : i32 to index
      %c0_229 = arith.constant 0 : index
      %423 = vector.load %arg5[%c3_228, %422, %c0_229] : memref<7x24x128xf32, #tpu.memory_space<vmem>>, vector<1x8x128xf32>
      %424 = vector.shape_cast %423 : vector<1x8x128xf32> to vector<8x128xf32>
      %425 = vector.broadcast %421 : f32 to vector<8x128xf32>
      %426 = arith.mulf %425, %424 : vector<8x128xf32>
      %427 = arith.addf %420, %426 : vector<8x128xf32>
      %c6_230 = arith.constant 6 : index
      %c4_231 = arith.constant 4 : index
      %428 = memref.load %arg1[%c6_230, %c4_231] : memref<8x7xf32, #tpu.memory_space<smem>>
      %c4_232 = arith.constant 4 : index
      %429 = arith.index_cast %4 : i32 to index
      %c0_233 = arith.constant 0 : index
      %430 = vector.load %arg5[%c4_232, %429, %c0_233] : memref<7x24x128xf32, #tpu.memory_space<vmem>>, vector<1x8x128xf32>
      %431 = vector.shape_cast %430 : vector<1x8x128xf32> to vector<8x128xf32>
      %432 = vector.broadcast %428 : f32 to vector<8x128xf32>
      %433 = arith.mulf %432, %431 : vector<8x128xf32>
      %434 = arith.addf %427, %433 : vector<8x128xf32>
      %c6_234 = arith.constant 6 : index
      %c5_235 = arith.constant 5 : index
      %435 = memref.load %arg1[%c6_234, %c5_235] : memref<8x7xf32, #tpu.memory_space<smem>>
      %c5_236 = arith.constant 5 : index
      %436 = arith.index_cast %4 : i32 to index
      %c0_237 = arith.constant 0 : index
      %437 = vector.load %arg5[%c5_236, %436, %c0_237] : memref<7x24x128xf32, #tpu.memory_space<vmem>>, vector<1x8x128xf32>
      %438 = vector.shape_cast %437 : vector<1x8x128xf32> to vector<8x128xf32>
      %439 = vector.broadcast %435 : f32 to vector<8x128xf32>
      %440 = arith.mulf %439, %438 : vector<8x128xf32>
      %441 = arith.addf %434, %440 : vector<8x128xf32>
      %c6_238 = arith.constant 6 : index
      %c6_239 = arith.constant 6 : index
      %442 = memref.load %arg1[%c6_238, %c6_239] : memref<8x7xf32, #tpu.memory_space<smem>>
      %c6_240 = arith.constant 6 : index
      %443 = arith.index_cast %4 : i32 to index
      %c0_241 = arith.constant 0 : index
      %444 = vector.load %arg5[%c6_240, %443, %c0_241] : memref<7x24x128xf32, #tpu.memory_space<vmem>>, vector<1x8x128xf32>
      %445 = vector.shape_cast %444 : vector<1x8x128xf32> to vector<8x128xf32>
      %446 = vector.broadcast %442 : f32 to vector<8x128xf32>
      %447 = arith.mulf %446, %445 : vector<8x128xf32>
      %448 = arith.addf %441, %447 : vector<8x128xf32>
      %c6_242 = arith.constant 6 : index
      %449 = memref.load %arg2[%c6_242] : memref<8xf32, #tpu.memory_space<smem>>
      %450 = vector.broadcast %449 : f32 to vector<8x128xf32>
      %451 = arith.addf %448, %450 : vector<8x128xf32>
      %cst_243 = arith.constant 0.000000e+00 : f32
      %452 = vector.broadcast %cst_243 : f32 to vector<8x128xf32>
      %453 = arith.maximumf %451, %452 : vector<8x128xf32>
      %c0_244 = arith.constant 0 : index
      %c6_245 = arith.constant 6 : index
      %454 = memref.load %arg3[%c0_244, %c6_245] : memref<3x8xf32, #tpu.memory_space<smem>>
      %455 = vector.broadcast %454 : f32 to vector<8x128xf32>
      %456 = arith.mulf %455, %453 : vector<8x128xf32>
      %457 = arith.addf %392, %456 : vector<8x128xf32>
      %c1_246 = arith.constant 1 : index
      %c6_247 = arith.constant 6 : index
      %458 = memref.load %arg3[%c1_246, %c6_247] : memref<3x8xf32, #tpu.memory_space<smem>>
      %459 = vector.broadcast %458 : f32 to vector<8x128xf32>
      %460 = arith.mulf %459, %453 : vector<8x128xf32>
      %461 = arith.addf %396, %460 : vector<8x128xf32>
      %c2_248 = arith.constant 2 : index
      %c6_249 = arith.constant 6 : index
      %462 = memref.load %arg3[%c2_248, %c6_249] : memref<3x8xf32, #tpu.memory_space<smem>>
      %463 = vector.broadcast %462 : f32 to vector<8x128xf32>
      %464 = arith.mulf %463, %453 : vector<8x128xf32>
      %465 = arith.addf %400, %464 : vector<8x128xf32>
      %c7 = arith.constant 7 : index
      %c0_250 = arith.constant 0 : index
      %466 = memref.load %arg1[%c7, %c0_250] : memref<8x7xf32, #tpu.memory_space<smem>>
      %c0_251 = arith.constant 0 : index
      %467 = arith.index_cast %4 : i32 to index
      %c0_252 = arith.constant 0 : index
      %468 = vector.load %arg5[%c0_251, %467, %c0_252] : memref<7x24x128xf32, #tpu.memory_space<vmem>>, vector<1x8x128xf32>
      %469 = vector.shape_cast %468 : vector<1x8x128xf32> to vector<8x128xf32>
      %470 = vector.broadcast %466 : f32 to vector<8x128xf32>
      %471 = arith.mulf %470, %469 : vector<8x128xf32>
      %c7_253 = arith.constant 7 : index
      %c1_254 = arith.constant 1 : index
      %472 = memref.load %arg1[%c7_253, %c1_254] : memref<8x7xf32, #tpu.memory_space<smem>>
      %c1_255 = arith.constant 1 : index
      %473 = arith.index_cast %4 : i32 to index
      %c0_256 = arith.constant 0 : index
      %474 = vector.load %arg5[%c1_255, %473, %c0_256] : memref<7x24x128xf32, #tpu.memory_space<vmem>>, vector<1x8x128xf32>
      %475 = vector.shape_cast %474 : vector<1x8x128xf32> to vector<8x128xf32>
      %476 = vector.broadcast %472 : f32 to vector<8x128xf32>
      %477 = arith.mulf %476, %475 : vector<8x128xf32>
      %478 = arith.addf %471, %477 : vector<8x128xf32>
      %c7_257 = arith.constant 7 : index
      %c2_258 = arith.constant 2 : index
      %479 = memref.load %arg1[%c7_257, %c2_258] : memref<8x7xf32, #tpu.memory_space<smem>>
      %c2_259 = arith.constant 2 : index
      %480 = arith.index_cast %4 : i32 to index
      %c0_260 = arith.constant 0 : index
      %481 = vector.load %arg5[%c2_259, %480, %c0_260] : memref<7x24x128xf32, #tpu.memory_space<vmem>>, vector<1x8x128xf32>
      %482 = vector.shape_cast %481 : vector<1x8x128xf32> to vector<8x128xf32>
      %483 = vector.broadcast %479 : f32 to vector<8x128xf32>
      %484 = arith.mulf %483, %482 : vector<8x128xf32>
      %485 = arith.addf %478, %484 : vector<8x128xf32>
      %c7_261 = arith.constant 7 : index
      %c3_262 = arith.constant 3 : index
      %486 = memref.load %arg1[%c7_261, %c3_262] : memref<8x7xf32, #tpu.memory_space<smem>>
      %c3_263 = arith.constant 3 : index
      %487 = arith.index_cast %4 : i32 to index
      %c0_264 = arith.constant 0 : index
      %488 = vector.load %arg5[%c3_263, %487, %c0_264] : memref<7x24x128xf32, #tpu.memory_space<vmem>>, vector<1x8x128xf32>
      %489 = vector.shape_cast %488 : vector<1x8x128xf32> to vector<8x128xf32>
      %490 = vector.broadcast %486 : f32 to vector<8x128xf32>
      %491 = arith.mulf %490, %489 : vector<8x128xf32>
      %492 = arith.addf %485, %491 : vector<8x128xf32>
      %c7_265 = arith.constant 7 : index
      %c4_266 = arith.constant 4 : index
      %493 = memref.load %arg1[%c7_265, %c4_266] : memref<8x7xf32, #tpu.memory_space<smem>>
      %c4_267 = arith.constant 4 : index
      %494 = arith.index_cast %4 : i32 to index
      %c0_268 = arith.constant 0 : index
      %495 = vector.load %arg5[%c4_267, %494, %c0_268] : memref<7x24x128xf32, #tpu.memory_space<vmem>>, vector<1x8x128xf32>
      %496 = vector.shape_cast %495 : vector<1x8x128xf32> to vector<8x128xf32>
      %497 = vector.broadcast %493 : f32 to vector<8x128xf32>
      %498 = arith.mulf %497, %496 : vector<8x128xf32>
      %499 = arith.addf %492, %498 : vector<8x128xf32>
      %c7_269 = arith.constant 7 : index
      %c5_270 = arith.constant 5 : index
      %500 = memref.load %arg1[%c7_269, %c5_270] : memref<8x7xf32, #tpu.memory_space<smem>>
      %c5_271 = arith.constant 5 : index
      %501 = arith.index_cast %4 : i32 to index
      %c0_272 = arith.constant 0 : index
      %502 = vector.load %arg5[%c5_271, %501, %c0_272] : memref<7x24x128xf32, #tpu.memory_space<vmem>>, vector<1x8x128xf32>
      %503 = vector.shape_cast %502 : vector<1x8x128xf32> to vector<8x128xf32>
      %504 = vector.broadcast %500 : f32 to vector<8x128xf32>
      %505 = arith.mulf %504, %503 : vector<8x128xf32>
      %506 = arith.addf %499, %505 : vector<8x128xf32>
      %c7_273 = arith.constant 7 : index
      %c6_274 = arith.constant 6 : index
      %507 = memref.load %arg1[%c7_273, %c6_274] : memref<8x7xf32, #tpu.memory_space<smem>>
      %c6_275 = arith.constant 6 : index
      %508 = arith.index_cast %4 : i32 to index
      %c0_276 = arith.constant 0 : index
      %509 = vector.load %arg5[%c6_275, %508, %c0_276] : memref<7x24x128xf32, #tpu.memory_space<vmem>>, vector<1x8x128xf32>
      %510 = vector.shape_cast %509 : vector<1x8x128xf32> to vector<8x128xf32>
      %511 = vector.broadcast %507 : f32 to vector<8x128xf32>
      %512 = arith.mulf %511, %510 : vector<8x128xf32>
      %513 = arith.addf %506, %512 : vector<8x128xf32>
      %c7_277 = arith.constant 7 : index
      %514 = memref.load %arg2[%c7_277] : memref<8xf32, #tpu.memory_space<smem>>
      %515 = vector.broadcast %514 : f32 to vector<8x128xf32>
      %516 = arith.addf %513, %515 : vector<8x128xf32>
      %cst_278 = arith.constant 0.000000e+00 : f32
      %517 = vector.broadcast %cst_278 : f32 to vector<8x128xf32>
      %518 = arith.maximumf %516, %517 : vector<8x128xf32>
      %c0_279 = arith.constant 0 : index
      %c7_280 = arith.constant 7 : index
      %519 = memref.load %arg3[%c0_279, %c7_280] : memref<3x8xf32, #tpu.memory_space<smem>>
      %520 = vector.broadcast %519 : f32 to vector<8x128xf32>
      %521 = arith.mulf %520, %518 : vector<8x128xf32>
      %522 = arith.addf %457, %521 : vector<8x128xf32>
      %c1_281 = arith.constant 1 : index
      %c7_282 = arith.constant 7 : index
      %523 = memref.load %arg3[%c1_281, %c7_282] : memref<3x8xf32, #tpu.memory_space<smem>>
      %524 = vector.broadcast %523 : f32 to vector<8x128xf32>
      %525 = arith.mulf %524, %518 : vector<8x128xf32>
      %526 = arith.addf %461, %525 : vector<8x128xf32>
      %c2_283 = arith.constant 2 : index
      %c7_284 = arith.constant 7 : index
      %527 = memref.load %arg3[%c2_283, %c7_284] : memref<3x8xf32, #tpu.memory_space<smem>>
      %528 = vector.broadcast %527 : f32 to vector<8x128xf32>
      %529 = arith.mulf %528, %518 : vector<8x128xf32>
      %530 = arith.addf %465, %529 : vector<8x128xf32>
      %c0_285 = arith.constant 0 : index
      %531 = arith.index_cast %4 : i32 to index
      %c0_286 = arith.constant 0 : index
      %532 = vector.load %arg6[%c0_285, %531, %c0_286] : memref<3x24x128xf32, #tpu.memory_space<vmem>>, vector<1x8x128xf32>
      %533 = vector.shape_cast %532 : vector<1x8x128xf32> to vector<8x128xf32>
      %534 = vector.shape_cast %522 : vector<8x128xf32> to vector<1x8x128xf32>
      tpu.vector_store %arg6[%c0_285, %531, %c0_286], %534 {strides = array<i32>} : memref<3x24x128xf32, #tpu.memory_space<vmem>>, vector<1x8x128xf32>,
      %c1_287 = arith.constant 1 : index
      %535 = arith.index_cast %4 : i32 to index
      %c0_288 = arith.constant 0 : index
      %536 = vector.load %arg6[%c1_287, %535, %c0_288] : memref<3x24x128xf32, #tpu.memory_space<vmem>>, vector<1x8x128xf32>
      %537 = vector.shape_cast %536 : vector<1x8x128xf32> to vector<8x128xf32>
      %538 = vector.shape_cast %526 : vector<8x128xf32> to vector<1x8x128xf32>
      tpu.vector_store %arg6[%c1_287, %535, %c0_288], %538 {strides = array<i32>} : memref<3x24x128xf32, #tpu.memory_space<vmem>>, vector<1x8x128xf32>,
      %c2_289 = arith.constant 2 : index
      %539 = arith.index_cast %4 : i32 to index
      %c0_290 = arith.constant 0 : index
      %540 = vector.load %arg6[%c2_289, %539, %c0_290] : memref<3x24x128xf32, #tpu.memory_space<vmem>>, vector<1x8x128xf32>
      %541 = vector.shape_cast %540 : vector<1x8x128xf32> to vector<8x128xf32>
      %542 = vector.shape_cast %530 : vector<8x128xf32> to vector<1x8x128xf32>
      tpu.vector_store %arg6[%c2_289, %539, %c0_290], %542 {strides = array<i32>} : memref<3x24x128xf32, #tpu.memory_space<vmem>>, vector<1x8x128xf32>,
    }
    %c3_i32_0 = arith.constant 3 : i32
    return
  }
  func.func @transform_0(%arg0: i32) -> (i32, i32) {
    %c0_i32 = arith.constant 0 : i32
    %c0_i32_0 = arith.constant 0 : i32
    %c0_i32_1 = arith.constant 0 : i32
    return %c0_i32, %c0_i32_0 : i32, i32
  }
  func.func @transform_1(%arg0: i32) -> i32 {
    %c0_i32 = arith.constant 0 : i32
    %c0_i32_0 = arith.constant 0 : i32
    return %c0_i32 : i32
  }
  func.func @transform_2(%arg0: i32) -> (i32, i32) {
    %c0_i32 = arith.constant 0 : i32
    %c0_i32_0 = arith.constant 0 : i32
    %c0_i32_1 = arith.constant 0 : i32
    return %c0_i32, %c0_i32_0 : i32, i32
  }
  func.func @transform_3(%arg0: i32) -> i32 {
    %c0_i32 = arith.constant 0 : i32
    %c0_i32_0 = arith.constant 0 : i32
    return %c0_i32 : i32
  }
  func.func @transform_4(%arg0: i32) -> (i32, i32, i32) {
    %c0_i32 = arith.constant 0 : i32
    %c0_i32_0 = arith.constant 0 : i32
    %c0_i32_1 = arith.constant 0 : i32
    return %c0_i32, %arg0, %c0_i32_0 : i32, i32, i32
  }
  func.func @transform_5(%arg0: i32) -> (i32, i32, i32) {
    %c0_i32 = arith.constant 0 : i32
    %c0_i32_0 = arith.constant 0 : i32
    %c0_i32_1 = arith.constant 0 : i32
    return %c0_i32, %arg0, %c0_i32_0 : i32, i32, i32
  }
}

</mosaic_0001>

<bundles_post_ra>
// kernel: tpu_custom_call.1
= control target key start
LH: loop header
LB: loop body
LE: loop exit
PB: predicated region body
PF: predicated region fallthrough
CT: control target
= control target key end

     0   :  { %10 = vsyncpa [#allocation5], 0  ;;  %s1175_s0 = inlined_call_operand.hbm [shape: f32[8,7], index: 0, kind: input, shape index: {}]   ;;  %s1176_s1 = inlined_call_operand.vmem [shape: f32[8], index: 1, kind: input, shape index: {}]   ;;  %s1177_s2 = inlined_call_operand.vmem [shape: f32[3,8], index: 2, kind: input, shape index: {}]   ;;  %s1178_s3 = inlined_call_operand.vmem [shape: f32[3], index: 3, kind: input, shape index: {}]   ;;  %s1179_s4 = inlined_call_operand.hbm [shape: f32[7,24,128], index: 4, kind: input, shape index: {}]   ;;  %s1180_s5 = inlined_call_operand.hbm [shape: f32[3,24,128], index: 5, kind: output, shape index: {}]  }
   0x1   :  { %11 = vsyncpa [#allocation6], 0 }
   0x2   :  { %12 = vsyncpa [#allocation9], 0 }
   0x3   :  { %13 = vsyncpa [#allocation3], 0  ;;  %s39_s20 = sshll.u32 %s1177_s2, 4  ;;  %s40_s20 = int_to_ptr.vmem [resolvable:$true] %s39_s20 }
   0x4   :  { %14 = vsyncpa [#allocation4], 0  ;;  %s637_s21 = scalar_lea.vmem %s40_s20, 64  ;;  %p642_p1 = scmp.lt.s32.totalorder %s40_s20, %s40_s20 }
   0x5   :  { %p638_p0 = scmp.ne.s32.totalorder %s40_s20, %s637_s21  ;;  %p643_p2 = scmp.lt.s32.totalorder %s637_s21, %s637_s21 }
   0x7   :  { %p644_p3 = por %p643_p2, %p642_p1 }
   0x9   :  { %p645_p4 = pnand %p644_p3, %p638_p0 }
   0xb   :  { %648 = shalt.err (!%p645_p4)
}
   0xc   :  { %s745_s22 = smov [#allocation8]   ;;  %s649_s25 = scalar_lea.hbm %s1175_s0, 128 }
   0xd   :  { %42 = dma.vmem_to_smem %s40_s20, 64, %s745_s22, [#allocation9]  }
   0xe   :  { %p650_p5 = scmp.ne.s32.totalorder %s1175_s0, %s649_s25  ;;  %p653_p6 = scmp.lt.u32.totalorder %s649_s25, %s1175_s0 }
  0x10   :  { %p655_p7 = pnand %p653_p6, %p650_p5 }
  0x12   :  { %658 = shalt.err (!%p655_p7)
}
  0x13   :  { %s746_s29 = smov [#allocation2]   ;;  %s29_s9 = sshll.u32 %s1176_s1, 4  ;;  %s30_s9 = int_to_ptr.vmem [resolvable:$true] %s29_s9 }
  0x14   :  { %22 = dma.hbm_to_smem %s1175_s0, 128, %s746_s29, [#allocation5]  }
  0x15   :  { %s49_s12 = sshll.u32 %s1178_s3, 4  ;;  %s659_s13 = scalar_lea.vmem %s30_s9, 16  ;;  %s50_s12 = int_to_ptr.vmem [resolvable:$true] %s49_s12 }
  0x16   :  { %p660_p8 = scmp.ne.s32.totalorder %s30_s9, %s659_s13  ;;  %p664_p9 = scmp.lt.s32.totalorder %s30_s9, %s30_s9 }
  0x17   :  { %p665_p10 = scmp.lt.s32.totalorder %s659_s13, %s659_s13 }
  0x19   :  { %p666_p11 = por %p665_p10, %p664_p9 }
  0x1b   :  { %p667_p12 = pnand %p666_p11, %p660_p8 }
  0x1d   :  { %670 = shalt.err (!%p667_p12)
}
  0x1e   :  { %s747_s14 = smov [#allocation7]   ;;  %s671_s0 = scalar_lea.vmem %s50_s12, 16 }
  0x1f   :  { %32 = dma.vmem_to_smem %s30_s9, 16, %s747_s14, [#allocation6]  }
  0x20   :  { %p672_p13 = scmp.ne.s32.totalorder %s50_s12, %s671_s0  ;;  %p676_p0 = scmp.lt.s32.totalorder %s50_s12, %s50_s12 }
  0x21   :  { %p677_p1 = scmp.lt.s32.totalorder %s671_s0, %s671_s0 }
  0x23   :  { %p678_p2 = por %p677_p1, %p676_p0 }
  0x25   :  { %p679_p3 = pnand %p678_p2, %p672_p13 }
  0x27   :  { %682 = shalt.err (!%p679_p3)
}
  0x28   :  { %s748_s1 = smov [#allocation10]   ;;  %s749_s3 = smov [#allocation11]  }
  0x29   :  { %52 = dma.vmem_to_smem %s50_s12, 16, %s748_s1, [#allocation9]  }
  0x2a   :  { %s58_s15 = sshll.u32 %s749_s3, 4  ;;  %s683_s18 = scalar_lea.hbm %s1179_s4, 2688  ;;  %s59_s15 = int_to_ptr.vmem [resolvable:$true] %s58_s15 }
  0x2b   :  { %p684_p4 = scmp.ne.s32.totalorder %s1179_s4, %s683_s18  ;;  %p687_p5 = scmp.lt.u32.totalorder %s683_s18, %s1179_s4 }
  0x2d   :  { %p689_p6 = pnand %p687_p5, %p684_p4 }
  0x2f   :  { %692 = shalt.err (!%p689_p6)
}
  0x30   :  { %s693_s23 = scalar_lea.vmem %s59_s15, 2688  ;;  %p698_p8 = scmp.lt.s32.totalorder %s59_s15, %s59_s15 }
  0x31   :  { %p694_p7 = scmp.ne.s32.totalorder %s59_s15, %s693_s23  ;;  %p699_p9 = scmp.lt.s32.totalorder %s693_s23, %s693_s23 }
  0x33   :  { %p700_p10 = por %p699_p9, %p698_p8 }
  0x35   :  { %p701_p11 = pnand %p700_p10, %p694_p7 }
  0x37   :  { %704 = shalt.err (!%p701_p11)
}
  0x38   :  { %s750_s24 = smov 128   ;;  %s751_s25 = smov 8  }
  0x39   :  { %64 = dma.hbm_to_vmem [thread:$0]  %s1179_s4, 2688, %s59_s15, [#allocation3], %s750_s24, %s750_s24, %s751_s25  }
  0x3a   :  { %731 = dma.done.wait [#allocation5], 128  }
  0x3b   :  { %732 = vsyncadd [#allocation5], 4294967168 }
  0x3c   :  { %733 = dma.done.wait [#allocation6], 16  }
  0x3d   :  { %734 = vsyncadd [#allocation6], 4294967280 }
  0x3e   :  { %735 = dma.done.wait [#allocation9], 80  }
  0x3f   :  { %736 = vsyncadd [#allocation9], 4294967216 }
  0x40   :  { %737 = dma.done.wait [#allocation3], 2688  }
  0x41   :  { %738 = vsyncadd [#allocation3], 4294964608 }
  0x42   :  { %80 = sfence }
  0x43   :  { %s819_s2 = smov 0  }
  0x44 LB: > { %s517_s28 = sshll.u32 %s743_s2, 3  ;;  %s94_s4 = sld [smem:[#allocation2]]  ;;  %s743_s2 = sphi %s819_s2, %s86_s2  }
  0x45   : > { %s520_s29 = sld [smem:[#allocation2 + $0x1]]  ;;  %s523_s30 = sld [smem:[#allocation2 + $0x2]] }
  0x46   : > { %s526_s6 = sld [smem:[#allocation2 + $0x3]]  ;;  %s529_s7 = sld [smem:[#allocation2 + $0x4]] }
  0x47   : > { %s825_s8 = sld [smem:[#allocation2 + $0x5]]  ;;  %s829_s9 = scalar_lea.vmem [#allocation11], %s517_s28 }
  0x48   : > { %v832_v0 = vld [vmem:[%s829_s9] sm:$0xff]  ;;  %s834_s10 = sld [smem:[#allocation2 + $0x6]]  ;;  %v837_v1 = vld [vmem:[%s829_s9 + $0x18] sm:$0xff]  ;;  %v840_v2 = vld [vmem:[%s829_s9 + $0x30] sm:$0xff]  ;;  %s842_s11 = sld [smem:[#allocation7]] }
  0x49   : > { %s844_s12 = sld [smem:[#allocation2 + $0x80]]  ;;  %s846_s13 = sld [smem:[#allocation2 + $0x81]]  ;;  %v850_v7 = vld [vmem:[%s829_s9 + $0x48] sm:$0xff]  ;;  %v859_v11 = vld [vmem:[%s829_s9 + $0x60] sm:$0xff]  ;;  %v874_v16 = vld [vmem:[%s829_s9 + $0x78] sm:$0xff] }
  0x4a   : > { %v97_v3 = vstv %s94_s4  ;;  %s852_s14 = sld [smem:[#allocation2 + $0x82]]  ;;  %s854_s0 = sld [smem:[#allocation2 + $0x83]]  ;;  %v887_v22 = vld [vmem:[%s829_s9 + $0x90] sm:$0xff] }
  0x4b   : > { %v98_v4 = vmul.f32 %v97_v3, %v832_v0  ;;  %v103_v5 = vstv %s520_s29  ;;  %v110_v6 = vstv %s523_s30  ;;  %s861_s1 = sld [smem:[#allocation2 + $0x84]]  ;;  %s863_s3 = sld [smem:[#allocation2 + $0x85]] }
  0x4c   : > { %v104_v8 = vmul.f32 %v837_v1, %v103_v5  ;;  %v111_v9 = vmul.f32 %v840_v2, %v110_v6  ;;  %v117_v10 = vstv %s526_s6  ;;  %v124_v12 = vstv %s529_s7  ;;  %s865_s15 = sld [smem:[#allocation2 + $0x86]]  ;;  %s867_s16 = sld [smem:[#allocation10]] }
  0x4d   : > { %v118_v14 = vmul.f32 %v850_v7, %v117_v10  ;;  %s870_s17 = sld [smem:[#allocation10 + $0x1]]  ;;  %v125_v15 = vmul.f32 %v859_v11, %v124_v12  ;;  %v131_v17 = vstv %s825_s8  ;;  %s877_s18 = sld [smem:[#allocation2 + $0x100]] }
  0x4e   : > { %v105_v13 = vadd.f32 %v104_v8, %v98_v4  ;;  %v138_v19 = vstv %s834_s10  ;;  %s882_s19 = sld [smem:[#allocation2 + $0x101]]  ;;  %s884_s20 = sld [smem:[#allocation2 + $0x102]]  ;;  %v132_v28 = vmul.f32 %v874_v16, %v131_v17  ;;  %v142_v36 = vstv %s842_s11 }
  0x4f   : > { %v158_v20 = vstv %s844_s12  ;;  %v161_v21 = vstv %s846_s13  ;;  %s893_s21 = sld [smem:[#allocation2 + $0x103]]  ;;  %s895_s22 = sld [smem:[#allocation2 + $0x104]]  ;;  %v139_v35 = vmul.f32 %v887_v22, %v138_v19 }
  0x50   : > { %v112_v18 = vadd.f32 %v111_v9, %v105_v13  ;;  %v159_v23 = vmul.f32 %v158_v20, %v832_v0  ;;  %v162_v24 = vmul.f32 %v837_v1, %v161_v21  ;;  %v165_v25 = vstv %s852_s14  ;;  %s898_s23 = sld [smem:[#allocation8]]  ;;  %s902_s26 = sld [smem:[#allocation2 + $0x105]] }
  0x51   : > { %v169_v26 = vstv %s854_s0  ;;  %v166_v29 = vmul.f32 %v840_v2, %v165_v25  ;;  %v173_v30 = vstv %s861_s1  ;;  %v177_v33 = vstv %s863_s3  ;;  %s906_s27 = sld [smem:[#allocation2 + $0x106]]  ;;  %s908_s4 = sld [smem:[#allocation10 + $0x2]] }
  0x52   : > { %v119_v27 = vadd.f32 %v118_v14, %v112_v18  ;;  %v163_v31 = vadd.f32 %v162_v24, %v159_v23  ;;  %v170_v32 = vmul.f32 %v850_v7, %v169_v26  ;;  %s912_s29 = sld [smem:[#allocation7 + $0x1]]  ;;  %v174_v38 = vmul.f32 %v859_v11, %v173_v30  ;;  %s917_s30 = sld [smem:[#allocation2 + $0x180]] }
  0x53   : > { %v178_v39 = vmul.f32 %v874_v16, %v177_v33  ;;  %v181_v40 = vstv %s865_s15  ;;  %s919_s6 = sld [smem:[#allocation2 + $0x181]]  ;;  %s921_s7 = sld [smem:[#allocation8 + $0x80]]  ;;  %v201_v42 = vstv %s877_s18  ;;  %v89_v57 = vstv %s867_s16 }
  0x54   : > { %v126_v34 = vadd.f32 %v125_v15, %v119_v27  ;;  %v167_v37 = vadd.f32 %v166_v29, %v163_v31  ;;  %s923_s8 = sld [smem:[#allocation8 + $0x100]]  ;;  %v204_v43 = vstv %s882_s19  ;;  %v208_v44 = vstv %s884_s20  ;;  %s931_s9 = sld [smem:[#allocation2 + $0x182]] }
  0x55   : > { %v202_v46 = vmul.f32 %v201_v42, %v832_v0  ;;  %v205_v47 = vmul.f32 %v837_v1, %v204_v43  ;;  %v209_v48 = vmul.f32 %v840_v2, %v208_v44  ;;  %s933_s10 = sld [smem:[#allocation2 + $0x183]]  ;;  %v182_v50 = vmul.f32 %v887_v22, %v181_v40  ;;  %s936_s11 = sld [smem:[#allocation8 + $0x1]] }
  0x56   : > { %v133_v41 = vadd.f32 %v132_v28, %v126_v34  ;;  %v171_v45 = vadd.f32 %v170_v32, %v167_v37  ;;  %v212_v51 = vstv %s893_s21  ;;  %v216_v52 = vstv %s895_s22  ;;  %s940_s12 = sld [smem:[#allocation7 + $0x2]]  ;;  %s947_s13 = sld [smem:[#allocation8 + $0x81]] }
  0x57   : > { %v206_v54 = vadd.f32 %v205_v47, %v202_v46  ;;  %v213_v55 = vmul.f32 %v850_v7, %v212_v51  ;;  %v220_v56 = vstv %s902_s26  ;;  %v91_v58 = vstv %s870_s17  ;;  %s949_s14 = sld [smem:[#allocation2 + $0x184]]  ;;  %s951_s0 = sld [smem:[#allocation8 + $0x101]] }
  0x58   : > { %v140_v49 = vadd.f32 %v139_v35, %v133_v41  ;;  %v175_v53 = vadd.f32 %v174_v38, %v171_v45  ;;  %v146_v60 = vstv %s898_s23  ;;  %v217_v63 = vmul.f32 %v859_v11, %v216_v52  ;;  %s955_s1 = sld [smem:[#allocation2 + $0x185]]  ;;  %s959_s3 = sld [smem:[#allocation8 + $0x2]] }
  0x59   : > { %v210_v62 = vadd.f32 %v209_v48, %v206_v54  ;;  %v224_v3 = vstv %s906_s27  ;;  %v185_v5 = vstv %s912_s29  ;;  %v221_v6 = vmul.f32 %v874_v16, %v220_v56  ;;  %s962_s15 = sld [smem:[#allocation2 + $0x186]]  ;;  %s964_s16 = sld [smem:[#allocation8 + $0x82]] }
  0x5a   : > { %v143_v59 = vadd.f32 %v142_v36, %v140_v49  ;;  %v179_v61 = vadd.f32 %v178_v39, %v175_v53  ;;  %v244_v8 = vstv %s917_s30  ;;  %v247_v13 = vstv %s919_s6  ;;  %s972_s17 = sld [smem:[#allocation2 + $0x200]]  ;;  %s976_s18 = sld [smem:[#allocation2 + $0x201]] }
  0x5b   : > { %v214_v10 = vadd.f32 %v213_v55, %v210_v62  ;;  %v245_v12 = vmul.f32 %v244_v8, %v832_v0  ;;  %v150_v14 = vstv %s921_s7  ;;  %v154_v15 = vstv %s923_s8  ;;  %s978_s19 = sld [smem:[#allocation2 + $0x202]]  ;;  %s984_s20 = sld [smem:[#allocation2 + $0x203]] }
  0x5c   : > { %v144_v4 = vmax.f32 %v143_v59, 0.0  ;;  %v183_v9 = vadd.f32 %v182_v50, %v179_v61  ;;  %v225_v17 = vmul.f32 %v887_v22, %v224_v3  ;;  %v248_v18 = vmul.f32 %v837_v1, %v247_v13  ;;  %s988_s21 = sld [smem:[#allocation2 + $0x204]]  ;;  %s992_s22 = sld [smem:[#allocation8 + $0x102]] }
  0x5d   : > { %v218_v20 = vadd.f32 %v217_v63, %v214_v10  ;;  %v251_v21 = vstv %s931_s9  ;;  %v255_v23 = vstv %s933_s10  ;;  %v93_v24 = vstv %s908_s4  ;;  %s995_s23 = sld [smem:[#allocation7 + $0x3]]  ;;  %s1000_s26 = sld [smem:[#allocation2 + $0x205]] }
  0x5e   : > { %v186_v19 = vadd.f32 %v185_v5, %v183_v9  ;;  %v189_v25 = vstv %s936_s11  ;;  %v228_v26 = vstv %s940_s12  ;;  %v249_v27 = vadd.f32 %v248_v18, %v245_v12  ;;  %s1004_s27 = sld [smem:[#allocation2 + $0x206]]  ;;  %s1006_s4 = sld [smem:[#allocation2 + $0x280]] }
  0x5f   : > { %v147_v28 = vmul.f32 %v146_v60, %v144_v4  ;;  %v151_v29 = vmul.f32 %v150_v14, %v144_v4  ;;  %v222_v30 = vadd.f32 %v221_v6, %v218_v20  ;;  %v252_v31 = vmul.f32 %v840_v2, %v251_v21  ;;  %s1012_s29 = sld [smem:[#allocation2 + $0x281]]  ;;  %s1014_s30 = sld [smem:[#allocation2 + $0x282]] }
  0x60   : > { %v155_v32 = vmul.f32 %v154_v15, %v144_v4  ;;  %v187_v33 = vmax.f32 %v186_v19, 0.0  ;;  %v256_v34 = vmul.f32 %v850_v7, %v255_v23  ;;  %v259_v35 = vstv %s949_s14  ;;  %s1019_s6 = sld [smem:[#allocation2 + $0x283]]  ;;  %s1028_s9 = sld [smem:[#allocation2 + $0x284]] }
  0x61   : > { %v193_v36 = vstv %s947_s13  ;;  %v197_v37 = vstv %s951_s0  ;;  %v226_v38 = vadd.f32 %v225_v17, %v222_v30  ;;  %v263_v39 = vstv %s955_s1  ;;  %s1021_s7 = sld [smem:[#allocation8 + $0x3]]  ;;  %s1034_s11 = sld [smem:[#allocation2 + $0x285]] }
  0x62   : > { %v232_v40 = vstv %s959_s3  ;;  %v253_v41 = vadd.f32 %v252_v31, %v249_v27  ;;  %v260_v42 = vmul.f32 %v859_v11, %v259_v35  ;;  %v267_v43 = vstv %s962_s15  ;;  %s1024_s8 = sld [smem:[#allocation8 + $0x83]]  ;;  %s1038_s12 = sld [smem:[#allocation7 + $0x4]] }
  0x63   : > { %v148_v44 = vadd.f32 %v147_v28, %v89_v57  ;;  %v152_v45 = vadd.f32 %v151_v29, %v91_v58  ;;  %v229_v46 = vadd.f32 %v228_v26, %v226_v38  ;;  %v236_v47 = vstv %s964_s16  ;;  %s1032_s10 = sld [smem:[#allocation8 + $0x103]]  ;;  %s1042_s13 = sld [smem:[#allocation2 + $0x286]] }
  0x64   : > { %v156_v48 = vadd.f32 %v155_v32, %v93_v24  ;;  %v190_v49 = vmul.f32 %v189_v25, %v187_v33  ;;  %v257_v50 = vadd.f32 %v256_v34, %v253_v41  ;;  %v264_v51 = vmul.f32 %v874_v16, %v263_v39  ;;  %s1044_s14 = sld [smem:[#allocation2 + $0x300]]  ;;  %s1049_s0 = sld [smem:[#allocation2 + $0x301]] }
  0x65   : > { %v268_v52 = vmul.f32 %v887_v22, %v267_v43  ;;  %v287_v53 = vstv %s972_s17  ;;  %v290_v54 = vstv %s976_s18  ;;  %v294_v55 = vstv %s978_s19  ;;  %s1051_s1 = sld [smem:[#allocation2 + $0x302]]  ;;  %s1056_s3 = sld [smem:[#allocation2 + $0x303]] }
  0x66   : > { %v261_v56 = vadd.f32 %v260_v42, %v257_v50  ;;  %v288_v57 = vmul.f32 %v287_v53, %v832_v0  ;;  %v291_v58 = vmul.f32 %v837_v1, %v290_v54  ;;  %v295_v59 = vmul.f32 %v840_v2, %v294_v55  ;;  %s1059_s15 = sld [smem:[#allocation8 + $0x4]]  ;;  %s1074_s19 = sld [smem:[#allocation2 + $0x305]] }
  0x67   : > { %v194_v60 = vmul.f32 %v193_v36, %v187_v33  ;;  %v198_v61 = vmul.f32 %v197_v37, %v187_v33  ;;  %v230_v62 = vmax.f32 %v229_v46, 0.0  ;;  %v298_v63 = vstv %s984_s20  ;;  %s1062_s16 = sld [smem:[#allocation2 + $0x304]]  ;;  %s1076_s20 = sld [smem:[#allocation2 + $0x306]] }
  0x68   : > { %v265_v3 = vadd.f32 %v264_v51, %v261_v56  ;;  %v292_v4 = vadd.f32 %v291_v58, %v288_v57  ;;  %v299_v5 = vmul.f32 %v850_v7, %v298_v63  ;;  %v302_v6 = vstv %s988_s21  ;;  %s1066_s17 = sld [smem:[#allocation8 + $0x84]]  ;;  %s1079_s21 = sld [smem:[#allocation7 + $0x5]] }
  0x69   : > { %v191_v8 = vadd.f32 %v190_v49, %v148_v44  ;;  %v240_v9 = vstv %s992_s22  ;;  %v271_v10 = vstv %s995_s23  ;;  %v303_v14 = vmul.f32 %v859_v11, %v302_v6  ;;  %s1068_s18 = sld [smem:[#allocation8 + $0x104]]  ;;  %s1085_s22 = sld [smem:[#allocation2 + $0x380]] }
  0x6a   : > { %v269_v12 = vadd.f32 %v268_v52, %v265_v3  ;;  %v296_v13 = vadd.f32 %v295_v59, %v292_v4  ;;  %v306_v15 = vstv %s1000_s26  ;;  %v195_v17 = vadd.f32 %v194_v60, %v152_v45  ;;  %s1090_s23 = sld [smem:[#allocation2 + $0x381]]  ;;  %s1092_s26 = sld [smem:[#allocation2 + $0x382]] }
  0x6b   : > { %v199_v18 = vadd.f32 %v198_v61, %v156_v48  ;;  %v233_v19 = vmul.f32 %v232_v40, %v230_v62  ;;  %v237_v20 = vmul.f32 %v236_v47, %v230_v62  ;;  %v307_v24 = vmul.f32 %v874_v16, %v306_v15  ;;  %s86_s2 = sadd.s32 1, %s743_s2  }
  0x6c   : > { %v272_v21 = vadd.f32 %v271_v10, %v269_v12  ;;  %v300_v23 = vadd.f32 %v299_v5, %v296_v13  ;;  %v310_v25 = vstv %s1004_s27  ;;  %v241_v26 = vmul.f32 %v240_v9, %v230_v62  ;;  %s1094_s27 = sld [smem:[#allocation8 + $0x5]]  ;;  %p83_p12 = scmp.ge.s32.totalorder %s86_s2, 3  }
  0x6d   : > { %v330_v27 = vstv %s1006_s4  ;;  %v333_v28 = vstv %s1012_s29  ;;  %v337_v29 = vstv %s1014_s30  ;;  %v341_v33 = vstv %s1019_s6  ;;  %s1099_s4 = sld [smem:[#allocation2 + $0x383]]  ;;  %s1102_s29 = sld [smem:[#allocation8 + $0x85]] }
  0x6e   : > { %v304_v30 = vadd.f32 %v303_v14, %v300_v23  ;;  %v331_v31 = vmul.f32 %v330_v27, %v832_v0  ;;  %v334_v32 = vmul.f32 %v837_v1, %v333_v28  ;;  %v273_v34 = vmax.f32 %v272_v21, 0.0  ;;  %s1105_s30 = sld [smem:[#allocation2 + $0x384]]  ;;  %s1113_s6 = sld [smem:[#allocation7 + $0x6]] }
  0x6f   : > { %v311_v35 = vmul.f32 %v887_v22, %v310_v25  ;;  %v338_v36 = vmul.f32 %v840_v2, %v337_v29  ;;  %v275_v37 = vstv %s1021_s7  ;;  %v279_v38 = vstv %s1024_s8  ;;  %s1115_s7 = sld [smem:[#allocation2 + $0x385]] }
  0x70   : > { %v308_v39 = vadd.f32 %v307_v24, %v304_v30  ;;  %v345_v40 = vstv %s1028_s9  ;;  %v283_v41 = vstv %s1032_s10  ;;  %v335_v42 = vadd.f32 %v334_v32, %v331_v31  ;;  %s1118_s8 = sld [smem:[#allocation8 + $0x105]]  ;;  %s1121_s9 = sld [smem:[#allocation2 + $0x386]] }
  0x71   : > { %v342_v43 = vmul.f32 %v850_v7, %v341_v33  ;;  %v349_v44 = vstv %s1034_s11  ;;  %v234_v45 = vadd.f32 %v233_v19, %v191_v8  ;;  %v238_v46 = vadd.f32 %v237_v20, %v195_v17  ;;  %s1129_s10 = sld [smem:[#allocation8 + $0x6]] }
  0x72   : > { %v242_v47 = vadd.f32 %v241_v26, %v199_v18  ;;  %v314_v48 = vstv %s1038_s12  ;;  %v276_v49 = vmul.f32 %v275_v37, %v273_v34  ;;  %v312_v50 = vadd.f32 %v311_v35, %v308_v39  ;;  %s1136_s11 = sld [smem:[#allocation8 + $0x86]] }
  0x73   : > { %v339_v51 = vadd.f32 %v338_v36, %v335_v42  ;;  %v346_v52 = vmul.f32 %v859_v11, %v345_v40  ;;  %v280_v53 = vmul.f32 %v279_v38, %v273_v34  ;;  %v350_v54 = vmul.f32 %v874_v16, %v349_v44  ;;  %s1138_s12 = sld [smem:[#allocation8 + $0x106]] }
  0x74   : > { %v353_v55 = vstv %s1042_s13  ;;  %v373_v56 = vstv %s1044_s14  ;;  %v376_v59 = vstv %s1049_s0  ;;  %v380_v60 = vstv %s1051_s1  ;;  %s1144_s13 = sld [smem:[#allocation7 + $0x7]] }
  0x75   : > { %v343_v57 = vadd.f32 %v342_v43, %v339_v51  ;;  %v374_v58 = vmul.f32 %v373_v56, %v832_v0  ;;  %v284_v61 = vmul.f32 %v283_v41, %v273_v34  ;;  %v377_v62 = vmul.f32 %v837_v1, %v376_v59  ;;  %s614_s14 = sld [smem:[#allocation8 + $0x7]] }
  0x76   : > { %v381_v63 = vmul.f32 %v840_v2, %v380_v60  ;;  %v384_v3 = vstv %s1056_s3  ;;  %v315_v4 = vadd.f32 %v314_v48, %v312_v50  ;;  %v354_v6 = vmul.f32 %v887_v22, %v353_v55  ;;  %s615_s0 = sld [smem:[#allocation8 + $0x87]]  ;;  %s458_s3 = scalar_lea.vmem [#allocation12], %s517_s28 }
  0x77   : > { %v347_v5 = vadd.f32 %v346_v52, %v343_v57  ;;  %v388_v8 = vstv %s1062_s16  ;;  %v318_v9 = vstv %s1059_s15  ;;  %v322_v10 = vstv %s1066_s17  ;;  %s616_s1 = sld [smem:[#allocation8 + $0x107]]  ;;  %s752_s15 = smov (%p83_p12), [#allocation12]  }
  0x78   : > { %v378_v12 = vadd.f32 %v377_v62, %v374_v58  ;;  %v385_v13 = vmul.f32 %v850_v7, %v384_v3  ;;  %v326_v14 = vstv %s1068_s18  ;;  %v392_v17 = vstv %s1074_s19  ;;  %s469_s16 = sshll.u32 (%p83_p12), %s752_s15, 4  ;;  %s470_s16 = int_to_ptr.vmem [resolvable:$true] %s469_s16 }
  0x79   : > { %v351_v15 = vadd.f32 %v350_v54, %v347_v5  ;;  %v396_v18 = vstv %s1076_s20  ;;  %v277_v19 = vadd.f32 %v276_v49, %v234_v45  ;;  %v357_v20 = vstv %s1079_s21  ;;  %s705_s17 = scalar_lea.vmem (%p83_p12), %s470_s16, 1152  ;;  %p710_p0 = scmp.lt.s32.totalorder (%p83_p12), %s470_s16, %s470_s16 }
  0x7a   : > { %v382_v21 = vadd.f32 %v381_v63, %v378_v12  ;;  %v389_v23 = vmul.f32 %v859_v11, %v388_v8  ;;  %v281_v24 = vadd.f32 %v280_v53, %v238_v46  ;;  %v285_v25 = vadd.f32 %v284_v61, %v242_v47  ;;  %p706_p13 = scmp.ne.s32.totalorder (%p83_p12), %s470_s16, %s705_s17  ;;  %p711_p1 = scmp.lt.s32.totalorder (%p83_p12), %s705_s17, %s705_s17 }
  0x7b   : > { %v316_v26 = vmax.f32 %v315_v4, 0.0  ;;  %v355_v27 = vadd.f32 %v354_v6, %v351_v15  ;;  %v393_v29 = vmul.f32 %v874_v16, %v392_v17  ;;  %v397_v30 = vmul.f32 %v887_v22, %v396_v18 }
  0x7c   : > { %v386_v28 = vadd.f32 %v385_v13, %v382_v21  ;;  %v416_v31 = vstv %s1085_s22  ;;  %v419_v34 = vstv %s1090_s23  ;;  %v423_v35 = vstv %s1092_s26  ;;  %p712_p2 = por (%p83_p12), %p711_p1, %p710_p0 }
  0x7d   : > { %v358_v32 = vadd.f32 %v357_v20, %v355_v27  ;;  %v417_v33 = vmul.f32 %v416_v31, %v832_v0  ;;  %v420_v37 = vmul.f32 %v837_v1, %v419_v34  ;;  %v424_v38 = vmul.f32 %v840_v2, %v423_v35 }
  0x7e   : > { %v390_v36 = vadd.f32 %v389_v23, %v386_v28  ;;  %v427_v39 = vstv %s1099_s4  ;;  %v319_v40 = vmul.f32 %v318_v9, %v316_v26  ;;  %v361_v41 = vstv %s1094_s27  ;;  %p713_p3 = pnand (%p83_p12), %p712_p2, %p706_p13 }
  0x7f   : > { %v365_v42 = vstv %s1102_s29  ;;  %v431_v0 = vstv %s1105_s30  ;;  %v323_v43 = vmul.f32 %v322_v10, %v316_v26  ;;  %v421_v45 = vadd.f32 %v420_v37, %v417_v33 }
  0x80   : > { %v394_v44 = vadd.f32 %v393_v29, %v390_v36  ;;  %v428_v46 = vmul.f32 %v850_v7, %v427_v39  ;;  %v327_v1 = vmul.f32 %v326_v14, %v316_v26  ;;  %v359_v47 = vmax.f32 %v358_v32, 0.0 }
  0x81   : > { %v400_v48 = vstv %s1113_s6  ;;  %v435_v2 = vstv %s1115_s7  ;;  %v369_v49 = vstv %s1118_s8  ;;  %v425_v51 = vadd.f32 %v424_v38, %v421_v45 }
  0x82   : > { %v398_v50 = vadd.f32 %v397_v30, %v394_v44  ;;  %v432_v52 = vmul.f32 %v859_v11, %v431_v0  ;;  %v320_v53 = vadd.f32 %v319_v40, %v277_v19  ;;  %v439_v54 = vstv %s1121_s9 }
  0x83   : > { %v324_v55 = vadd.f32 %v323_v43, %v281_v24  ;;  %v429_v57 = vadd.f32 %v428_v46, %v425_v51  ;;  %v436_v7 = vmul.f32 %v874_v16, %v435_v2  ;;  %v328_v58 = vadd.f32 %v327_v1, %v285_v25 }
  0x84   : > { %v401_v56 = vadd.f32 %v400_v48, %v398_v50  ;;  %v362_v59 = vmul.f32 %v361_v41, %v359_v47  ;;  %v366_v60 = vmul.f32 %v365_v42, %v359_v47  ;;  %v370_v61 = vmul.f32 %v369_v49, %v359_v47 }
  0x85   : > { %v433_v11 = vadd.f32 %v432_v52, %v429_v57  ;;  %v440_v63 = vmul.f32 %v887_v22, %v439_v54  ;;  %v404_v3 = vstv %s1129_s10  ;;  %v408_v4 = vstv %s1136_s11 }
  0x86   : > { %v402_v62 = vmax.f32 %v401_v56, 0.0  ;;  %v412_v5 = vstv %s1138_s12  ;;  %v363_v8 = vadd.f32 %v362_v59, %v320_v53  ;;  %v367_v9 = vadd.f32 %v366_v60, %v324_v55 }
  0x87   : > { %v437_v6 = vadd.f32 %v436_v7, %v433_v11  ;;  %v371_v10 = vadd.f32 %v370_v61, %v328_v58  ;;  %v443_v16 = vstv %s1144_s13  ;;  %v447_v18 = vstv %s614_s14 }
  0x88   : > { %v405_v12 = vmul.f32 %v404_v3, %v402_v62  ;;  %v409_v13 = vmul.f32 %v408_v4, %v402_v62  ;;  %v413_v14 = vmul.f32 %v412_v5, %v402_v62  ;;  %v451_v19 = vstv %s615_s0 }
  0x89   : > { %v441_v15 = vadd.f32 %v440_v63, %v437_v6  ;;  %v455_v20 = vstv %s616_s1 }
  0x8a   : > { %v406_v21 = vadd.f32 %v405_v12, %v363_v8  ;;  %v410_v23 = vadd.f32 %v409_v13, %v367_v9  ;;  %v414_v22 = vadd.f32 %v413_v14, %v371_v10 }
  0x8b   : > { %v444_v17 = vadd.f32 %v443_v16, %v441_v15 }
  0x8d   : > { %v445_v24 = vmax.f32 %v444_v17, 0.0 }
  0x8e   :  { %85 = sbr.rel (!%p83_p12) target bundleno = 68 (0x44), region = 77 }
  0x8f   : > { %v448_v25 = vmul.f32 %v447_v18, %v445_v24  ;;  %v452_v26 = vmul.f32 %v451_v19, %v445_v24  ;;  %v456_v27 = vmul.f32 %v455_v20, %v445_v24 }
  0x91   : > { %v449_v28 = vadd.f32 %v448_v25, %v406_v21  ;;  %v453_v29 = vadd.f32 %v452_v26, %v410_v23  ;;  %v457_v30 = vadd.f32 %v456_v27, %v414_v22 }
  0x93   : > { %459 = vst [vmem:[%s458_s3] sm:$0xff] %v449_v28  ;;  %618 = vst [vmem:[%s458_s3 + $0x18] sm:$0xff] %v453_v29 }
  0x94   : > { %620 = vst [vmem:[%s458_s3 + $0x30] sm:$0xff] %v457_v30 }
  0x95   :  { %716 = shalt.err (!%p713_p3)
}
  0x96   :  { %s717_s19 = scalar_lea.hbm %s1180_s5, 1152 }
  0x97   :  { %p718_p4 = scmp.ne.s32.totalorder %s1180_s5, %s717_s19  ;;  %p721_p5 = scmp.lt.u32.totalorder %s717_s19, %s1180_s5 }
  0x99   :  { %p723_p6 = pnand %p721_p5, %p718_p4 }
  0x9b   :  { %726 = shalt.err (!%p723_p6)
}
  0x9c   :  { %475 = dma.vmem_to_hbm [thread:$0]  %s470_s16, 1152, %s1180_s5, [#allocation4], %s750_s24, %s750_s24, %s751_s25  }
  0x9d   :  { %739 = dma.done.wait [#allocation4], 1152  }
  0x9e   :  { %740 = vsyncadd [#allocation4], 4294966144 }
  0x9f   :  { %479 = vsyncpa [#allocation3], 1 }
  0xa0   :  { %480 = vsyncpa [#allocation4], 1 }
  0xa1   :  { %481 = vsyncpa [#allocation5], 1 }
  0xa2   :  { %482 = vsyncpa [#allocation6], 1 }
  0xa3   :  { %483 = vsyncpa [#allocation9], 1 }

</bundles_post_ra>
